<compile_context>
chip_gen: v5e
topology: v5e:2x2
jax: 0.10.0
libtpu: 0.0.40
codegen_flags: <defaults>
</compile_context>

<pallas_src>
import jax
import jax.numpy as jnp
from jax.experimental import pallas as pl
from jax.experimental.pallas import tpu as pltpu


def _make_spatial_attention_kernel(K: int, H: int, TH: int, fuse_multiply: bool):
    P = K // 2
    n_t = H // TH

    def kernel(w_ref, x_ref, *rest):
        # w_ref  : SMEM f32[2*K*K] -- conv weight flattened (in_channel, ky, kx); in 0 = avg, 1 = max
        # x_ref  : VMEM  [1, C, TH, W]  (one H tile of one sample, any float dtype)
        # o_ref  : VMEM  [1, 1, H, W]   attention map (same block for all t of a sample)
        # y_ref  : VMEM  [1, C, H, W]   (only when fuse_multiply) x * attention
        # pad_ref: VMEM f32[2, H+2P, W+2P]  zero-padded {avg, max} maps, persistent across t
        if fuse_multiply:
            o_ref, y_ref, pad_ref = rest
        else:
            o_ref, pad_ref = rest

        t = pl.program_id(1)
        C = x_ref.shape[1]
        W = x_ref.shape[3]

        # ---- once per sample: zero ONLY the P-wide border frame of the padded map ----
        # (interior rows are fully overwritten by the per-tile reduction writes below)
        @pl.when(t == 0)
        def _():
            zrow = jnp.zeros((P, W + 2 * P), jnp.float32)
            zcol = jnp.zeros((H, P), jnp.float32)
            for c in range(2):
                pad_ref[c, 0:P, :] = zrow                       # top border rows
                pad_ref[c, P + H:P + H + P, :] = zrow           # bottom border rows
                pad_ref[c, P:P + H, 0:P] = zcol                 # left border cols
                pad_ref[c, P:P + H, P + W:P + W + P] = zcol     # right border cols

        # ---- channel mean / max for this H tile (f32 accumulation; x may be bf16) ----
        xs = x_ref[0].astype(jnp.float32)          # (C, TH, W)
        s = jnp.sum(xs, axis=0)                    # (TH, W)
        m = jnp.max(xs, axis=0)                    # (TH, W)
        avg = s * (1.0 / float(C))

        r0 = P + t * TH
        pad_ref[0, pl.ds(r0, TH), pl.ds(P, W)] = avg
        pad_ref[1, pl.ds(r0, TH), pl.ds(P, W)] = m

        # ---- last tile of the sample: KxK conv (2 -> 1, no bias) + sigmoid ----
        # 2-in/1-out KxK is far below MXU efficiency: VPU shifted accumulates.
        # NOTE: the dx-offset slice reads could be moved to pltpu.roll(axis=-1) +
        # border masks (XLU slot) if the vld slots ever bind; kept as static
        # scratch slices here for robust lowering across W sizes.
        @pl.when(t == n_t - 1)
        def _():
            acc = jnp.zeros((H, W), jnp.float32)
            for c in range(2):
                for dy in range(K):
                    for dx in range(K):
                        wgt = w_ref[(c * K + dy) * K + dx]        # scalar from SMEM
                        acc = acc + wgt * pad_ref[c, dy:dy + H, dx:dx + W]
            attn = jax.nn.sigmoid(acc)
            o_ref[0, 0] = attn.astype(o_ref.dtype)
            if fuse_multiply:
                # x is whole-sample resident (n_t == 1 enforced by the wrapper).
                y_ref[0] = (xs * attn[None, :, :]).astype(y_ref.dtype)

    return kernel


def _pick_h_tile(C, H, W, itemsize, budget_bytes=6 * 1024 * 1024):
    """Largest H tile whose double-buffered x block (2 * C*TH*W*itemsize) fits the
    budget, preferring sublane-aligned (multiple-of-8) divisors of H."""
    if 2 * C * H * W * itemsize <= budget_bytes:
        return H
    divisors = [d for d in range(1, H + 1) if H % d == 0]
    aligned = [d for d in divisors
               if d % 8 == 0 and 2 * C * d * W * itemsize <= budget_bytes]
    if aligned:
        return max(aligned)
    fitting = [d for d in divisors if 2 * C * d * W * itemsize <= budget_bytes]
    if fitting:
        return max(fitting)
    return min(divisors)


def spatial_attention_forward(x_nchw, conv_weight, *, fuse_multiply=False,
                              h_tile=None, out_dtype=None):
    """x_nchw: float[N, C, H, W] (f32 or bf16); conv_weight: [1, 2, K, K] (PyTorch OIHW, bias=False).

    Returns attn = sigmoid(conv_KxK(concat([mean_c(x), max_c(x)], c)))  with shape [N, 1, H, W].
    If fuse_multiply=True, returns (attn, x * attn) computed in one HBM pass over x."""
    N, C, H, W = x_nchw.shape
    K = conv_weight.shape[-1]
    assert conv_weight.shape == (1, 2, K, K) and K in (3, 7), "kernel size must be 3 or 7"
    P = K // 2
    if out_dtype is None:
        out_dtype = x_nchw.dtype

    itemsize = jnp.dtype(x_nchw.dtype).itemsize
    if h_tile is None:
        h_tile = _pick_h_tile(C, H, W, itemsize)
    assert H % h_tile == 0, "h_tile must divide H"
    n_t = H // h_tile
    if fuse_multiply:
        # Fused x*attn needs the whole sample resident in the block.
        assert n_t == 1, "fuse_multiply requires the whole-sample (untiled-H) block"

    w_flat = conv_weight.reshape(-1).astype(jnp.float32)        # [2*K*K], (in, ky, kx)-major

    out_shapes = [jax.ShapeDtypeStruct((N, 1, H, W), out_dtype)]
    out_specs = [pl.BlockSpec((1, 1, H, W), lambda b, t: (b, 0, 0, 0))]
    if fuse_multiply:
        out_shapes.append(jax.ShapeDtypeStruct((N, C, H, W), out_dtype))
        out_specs.append(pl.BlockSpec((1, C, H, W), lambda b, t: (b, 0, 0, 0)))

    out_itemsize = jnp.dtype(out_dtype).itemsize
    flops = N * H * W * (2 * C + 4 * K * K + 5)
    bytes_accessed = (N * C * H * W * itemsize                      # read x
                      + N * H * W * out_itemsize                    # write attn
                      + (N * C * H * W * out_itemsize if fuse_multiply else 0)
                      + 4 * w_flat.size)

    return pl.pallas_call(
        _make_spatial_attention_kernel(K, H, h_tile, fuse_multiply),
        out_shape=tuple(out_shapes) if fuse_multiply else out_shapes[0],
        grid=(N, n_t),
        in_specs=[
            pl.BlockSpec(memory_space=pltpu.MemorySpace.SMEM),          # flat conv weights
            pl.BlockSpec((1, C, h_tile, W), lambda b, t: (b, 0, t, 0)),  # one H tile of one sample
        ],
        out_specs=tuple(out_specs) if fuse_multiply else out_specs[0],
        scratch_shapes=[pltpu.VMEM((2, H + 2 * P, W + 2 * P), jnp.float32)],
        # H-tile axis must be "arbitrary": the {avg,max} scratch and the
        # revisited output block carry state across t on one TensorCore.
        compiler_params=pltpu.CompilerParams(
            dimension_semantics=("parallel", "arbitrary")),
        cost_estimate=pl.CostEstimate(
            flops=flops, transcendentals=N * H * W, bytes_accessed=bytes_accessed),
    )(w_flat, x_nchw)


def spatial_attention_reference(x, conv_weight):
    """Pure-JAX reference matching the PyTorch forward."""
    avg = jnp.mean(x, axis=1, keepdims=True)
    mx = jnp.max(x, axis=1, keepdims=True)
    xc = jnp.concatenate([avg, mx], axis=1)                     # [N, 2, H, W]
    pad = conv_weight.shape[-1] // 2
    y = jax.lax.conv_general_dilated(
        xc, conv_weight, window_strides=(1, 1),
        padding=((pad, pad), (pad, pad)),
        dimension_numbers=("NCHW", "OIHW", "NCHW"),
        precision=jax.lax.Precision.HIGHEST)
    return jax.nn.sigmoid(y)


if __name__ == "__main__":
    key = jax.random.PRNGKey(0)
    kx, kw, kx2 = jax.random.split(key, 3)

    N, C, H, W = 2, 4, 16, 16
    kernel_size = 7
    x = jax.random.normal(kx, (N, C, H, W), jnp.float32)
    conv_weight = jax.random.normal(kw, (1, 2, kernel_size, kernel_size),
                                    jnp.float32) / float(kernel_size)
    ref = spatial_attention_reference(x, conv_weight)

    # 1) f32, whole-sample block: matches the PyTorch module forward exactly.
    out = jax.block_until_ready(spatial_attention_forward(x, conv_weight))
    assert out.shape == (N, 1, H, W)
    assert jnp.allclose(out, ref, atol=1e-5, rtol=1e-5), "f32 mismatch vs JAX reference"

    # 2) bf16 input / bf16 output (halves the HBM read of x; f32 accumulation inside).
    xb = x.astype(jnp.bfloat16)
    outb = jax.block_until_ready(spatial_attention_forward(xb, conv_weight))
    refb = spatial_attention_reference(xb.astype(jnp.float32), conv_weight)
    assert outb.dtype == jnp.bfloat16
    assert jnp.allclose(outb.astype(jnp.float32), refb, atol=2e-2), "bf16 mismatch"

    # 3) H-tiled path (the VMEM-safe configuration used for large C*H*W on v7x/v5e).
    H2 = 32
    x2 = jax.random.normal(kx2, (N, C, H2, W), jnp.float32)
    out2 = jax.block_until_ready(spatial_attention_forward(x2, conv_weight, h_tile=8))
    ref2 = spatial_attention_reference(x2, conv_weight)
    assert jnp.allclose(out2, ref2, atol=1e-5, rtol=1e-5), "H-tiled mismatch"

    # 4) fused x * attention (one HBM pass over x for the CBAM multiply).
    attn, y = spatial_attention_forward(x, conv_weight, fuse_multiply=True)
    y = jax.block_until_ready(y)
    assert jnp.allclose(attn, ref, atol=1e-5, rtol=1e-5), "fused attn mismatch"
    assert jnp.allclose(y, x * ref, atol=1e-4, rtol=1e-5), "fused multiply mismatch"

    print("KERNEL_OK")
</pallas_src>

<mosaic_0001>
module attributes {stable_mosaic.version = 11 : i64} {
  func.func @kernel(%arg0: i32, %arg1: i32, %arg2: memref<98xf32, #tpu.memory_space<smem>>, %arg3: memref<1x4x16x16xf32, #tpu.memory_space<vmem>>, %arg4: memref<1x1x16x16xf32, #tpu.memory_space<vmem>>, %arg5: memref<2x22x22xf32, #tpu.memory_space<vmem>>) attributes {dimension_semantics = [#tpu.dimension_semantics<parallel>, #tpu.dimension_semantics<arbitrary>], iteration_bounds = array<i64: 2, 1>, scalar_prefetch = 0 : i64, scratch_operands = 1 : i64, tpu.core_type = #tpu.core_type<tc>, window_params = [{transform_indices = @transform_0, window_bounds = array<i64: 98>}, {transform_indices = @transform_1, window_bounds = array<i64: 1, 4, 16, 16>}, {transform_indices = @transform_2, window_bounds = array<i64: 1, 1, 16, 16>}]} {
    %c0_i32 = arith.constant 0 : i32
    %0 = arith.cmpi eq, %arg1, %c0_i32 : i32
    %1 = arith.extui %0 : i1 to i32
    %c0_i32_0 = arith.constant 0 : i32
    %2 = arith.cmpi ne, %1, %c0_i32_0 : i32
    scf.if %2 {
      %cst_10 = arith.constant 0.000000e+00 : f32
      %22 = vector.broadcast %cst_10 : f32 to vector<3x22xf32>
      %cst_11 = arith.constant 0.000000e+00 : f32
      %23 = vector.broadcast %cst_11 : f32 to vector<16x3xf32>
      %c0_12 = arith.constant 0 : index
      %c0_13 = arith.constant 0 : index
      %c0_14 = arith.constant 0 : index
      %24 = vector.load %arg5[%c0_12, %c0_13, %c0_14] : memref<2x22x22xf32, #tpu.memory_space<vmem>>, vector<1x3x22xf32>
      %25 = vector.shape_cast %24 : vector<1x3x22xf32> to vector<3x22xf32>
      %26 = vector.shape_cast %22 : vector<3x22xf32> to vector<1x3x22xf32>
      tpu.vector_store %arg5[%c0_12, %c0_13, %c0_14], %26 {strides = array<i32>} : memref<2x22x22xf32, #tpu.memory_space<vmem>>, vector<1x3x22xf32>,
      %c0_15 = arith.constant 0 : index
      %c19 = arith.constant 19 : index
      %c0_16 = arith.constant 0 : index
      %27 = vector.load %arg5[%c0_15, %c19, %c0_16] : memref<2x22x22xf32, #tpu.memory_space<vmem>>, vector<1x3x22xf32>
      %28 = vector.shape_cast %27 : vector<1x3x22xf32> to vector<3x22xf32>
      %29 = vector.shape_cast %22 : vector<3x22xf32> to vector<1x3x22xf32>
      tpu.vector_store %arg5[%c0_15, %c19, %c0_16], %29 {strides = array<i32>} : memref<2x22x22xf32, #tpu.memory_space<vmem>>, vector<1x3x22xf32>,
      %c0_17 = arith.constant 0 : index
      %c3_18 = arith.constant 3 : index
      %c0_19 = arith.constant 0 : index
      %30 = vector.load %arg5[%c0_17, %c3_18, %c0_19] : memref<2x22x22xf32, #tpu.memory_space<vmem>>, vector<1x16x3xf32>
      %31 = vector.shape_cast %30 : vector<1x16x3xf32> to vector<16x3xf32>
      %32 = vector.shape_cast %23 : vector<16x3xf32> to vector<1x16x3xf32>
      tpu.vector_store %arg5[%c0_17, %c3_18, %c0_19], %32 {strides = array<i32>} : memref<2x22x22xf32, #tpu.memory_space<vmem>>, vector<1x16x3xf32>,
      %c0_20 = arith.constant 0 : index
      %c3_21 = arith.constant 3 : index
      %c19_22 = arith.constant 19 : index
      %33 = vector.load %arg5[%c0_20, %c3_21, %c19_22] : memref<2x22x22xf32, #tpu.memory_space<vmem>>, vector<1x16x3xf32>
      %34 = vector.shape_cast %33 : vector<1x16x3xf32> to vector<16x3xf32>
      %35 = vector.shape_cast %23 : vector<16x3xf32> to vector<1x16x3xf32>
      tpu.vector_store %arg5[%c0_20, %c3_21, %c19_22], %35 {strides = array<i32>} : memref<2x22x22xf32, #tpu.memory_space<vmem>>, vector<1x16x3xf32>,
      %c1_23 = arith.constant 1 : index
      %c0_24 = arith.constant 0 : index
      %c0_25 = arith.constant 0 : index
      %36 = vector.load %arg5[%c1_23, %c0_24, %c0_25] : memref<2x22x22xf32, #tpu.memory_space<vmem>>, vector<1x3x22xf32>
      %37 = vector.shape_cast %36 : vector<1x3x22xf32> to vector<3x22xf32>
      %38 = vector.shape_cast %22 : vector<3x22xf32> to vector<1x3x22xf32>
      tpu.vector_store %arg5[%c1_23, %c0_24, %c0_25], %38 {strides = array<i32>} : memref<2x22x22xf32, #tpu.memory_space<vmem>>, vector<1x3x22xf32>,
      %c1_26 = arith.constant 1 : index
      %c19_27 = arith.constant 19 : index
      %c0_28 = arith.constant 0 : index
      %39 = vector.load %arg5[%c1_26, %c19_27, %c0_28] : memref<2x22x22xf32, #tpu.memory_space<vmem>>, vector<1x3x22xf32>
      %40 = vector.shape_cast %39 : vector<1x3x22xf32> to vector<3x22xf32>
      %41 = vector.shape_cast %22 : vector<3x22xf32> to vector<1x3x22xf32>
      tpu.vector_store %arg5[%c1_26, %c19_27, %c0_28], %41 {strides = array<i32>} : memref<2x22x22xf32, #tpu.memory_space<vmem>>, vector<1x3x22xf32>,
      %c1_29 = arith.constant 1 : index
      %c3_30 = arith.constant 3 : index
      %c0_31 = arith.constant 0 : index
      %42 = vector.load %arg5[%c1_29, %c3_30, %c0_31] : memref<2x22x22xf32, #tpu.memory_space<vmem>>, vector<1x16x3xf32>
      %43 = vector.shape_cast %42 : vector<1x16x3xf32> to vector<16x3xf32>
      %44 = vector.shape_cast %23 : vector<16x3xf32> to vector<1x16x3xf32>
      tpu.vector_store %arg5[%c1_29, %c3_30, %c0_31], %44 {strides = array<i32>} : memref<2x22x22xf32, #tpu.memory_space<vmem>>, vector<1x16x3xf32>,
      %c1_32 = arith.constant 1 : index
      %c3_33 = arith.constant 3 : index
      %c19_34 = arith.constant 19 : index
      %45 = vector.load %arg5[%c1_32, %c3_33, %c19_34] : memref<2x22x22xf32, #tpu.memory_space<vmem>>, vector<1x16x3xf32>
      %46 = vector.shape_cast %45 : vector<1x16x3xf32> to vector<16x3xf32>
      %47 = vector.shape_cast %23 : vector<16x3xf32> to vector<1x16x3xf32>
      tpu.vector_store %arg5[%c1_32, %c3_33, %c19_34], %47 {strides = array<i32>} : memref<2x22x22xf32, #tpu.memory_space<vmem>>, vector<1x16x3xf32>,
    } else {
    }
    %c0 = arith.constant 0 : index
    %c0_1 = arith.constant 0 : index
    %c0_2 = arith.constant 0 : index
    %c0_3 = arith.constant 0 : index
    %3 = vector.load %arg3[%c0, %c0_1, %c0_2, %c0_3] : memref<1x4x16x16xf32, #tpu.memory_space<vmem>>, vector<1x4x16x16xf32>
    %4 = vector.shape_cast %3 : vector<1x4x16x16xf32> to vector<4x16x16xf32>
    %cst = arith.constant dense<0.000000e+00> : vector<16x16xf32>
    %5 = vector.multi_reduction <add>, %4, %cst [0] : vector<4x16x16xf32> to vector<16x16xf32>
    %cst_4 = arith.constant dense<0xFF800000> : vector<16x16xf32>
    %6 = vector.multi_reduction <maximumf>, %4, %cst_4 [0] : vector<4x16x16xf32> to vector<16x16xf32>
    %cst_5 = arith.constant 2.500000e-01 : f32
    %7 = vector.broadcast %cst_5 : f32 to vector<16x16xf32>
    %8 = arith.mulf %5, %7 : vector<16x16xf32>
    %c16_i32 = arith.constant 16 : i32
    %9 = arith.muli %arg1, %c16_i32 : i32
    %c3_i32 = arith.constant 3 : i32
    %10 = arith.addi %c3_i32, %9 : i32
    %c0_6 = arith.constant 0 : index
    %11 = arith.index_cast %10 : i32 to index
    %c3 = arith.constant 3 : index
    %12 = vector.load %arg5[%c0_6, %11, %c3] : memref<2x22x22xf32, #tpu.memory_space<vmem>>, vector<1x16x16xf32>
    %13 = vector.shape_cast %12 : vector<1x16x16xf32> to vector<16x16xf32>
    %14 = vector.shape_cast %8 : vector<16x16xf32> to vector<1x16x16xf32>
    tpu.vector_store %arg5[%c0_6, %11, %c3], %14 {strides = array<i32>} : memref<2x22x22xf32, #tpu.memory_space<vmem>>, vector<1x16x16xf32>,
    %c1 = arith.constant 1 : index
    %15 = arith.index_cast %10 : i32 to index
    %c3_7 = arith.constant 3 : index
    %16 = vector.load %arg5[%c1, %15, %c3_7] : memref<2x22x22xf32, #tpu.memory_space<vmem>>, vector<1x16x16xf32>
    %17 = vector.shape_cast %16 : vector<1x16x16xf32> to vector<16x16xf32>
    %18 = vector.shape_cast %6 : vector<16x16xf32> to vector<1x16x16xf32>
    tpu.vector_store %arg5[%c1, %15, %c3_7], %18 {strides = array<i32>} : memref<2x22x22xf32, #tpu.memory_space<vmem>>, vector<1x16x16xf32>,
    %c0_i32_8 = arith.constant 0 : i32
    %19 = arith.cmpi eq, %arg1, %c0_i32_8 : i32
    %20 = arith.extui %19 : i1 to i32
    %c0_i32_9 = arith.constant 0 : i32
    %21 = arith.cmpi ne, %20, %c0_i32_9 : i32
    scf.if %21 {
      %cst_10 = arith.constant 0.000000e+00 : f32
      %22 = vector.broadcast %cst_10 : f32 to vector<16x16xf32>
      %c0_11 = arith.constant 0 : index
      %23 = memref.load %arg2[%c0_11] : memref<98xf32, #tpu.memory_space<smem>>
      %c0_12 = arith.constant 0 : index
      %c0_13 = arith.constant 0 : index
      %c0_14 = arith.constant 0 : index
      %24 = vector.load %arg5[%c0_12, %c0_13, %c0_14] : memref<2x22x22xf32, #tpu.memory_space<vmem>>, vector<1x16x16xf32>
      %25 = vector.shape_cast %24 : vector<1x16x16xf32> to vector<16x16xf32>
      %26 = vector.broadcast %23 : f32 to vector<16x16xf32>
      %27 = arith.mulf %26, %25 : vector<16x16xf32>
      %28 = arith.addf %22, %27 : vector<16x16xf32>
      %c1_15 = arith.constant 1 : index
      %29 = memref.load %arg2[%c1_15] : memref<98xf32, #tpu.memory_space<smem>>
      %c0_16 = arith.constant 0 : index
      %c0_17 = arith.constant 0 : index
      %c1_18 = arith.constant 1 : index
      %30 = vector.load %arg5[%c0_16, %c0_17, %c1_18] : memref<2x22x22xf32, #tpu.memory_space<vmem>>, vector<1x16x16xf32>
      %31 = vector.shape_cast %30 : vector<1x16x16xf32> to vector<16x16xf32>
      %32 = vector.broadcast %29 : f32 to vector<16x16xf32>
      %33 = arith.mulf %32, %31 : vector<16x16xf32>
      %34 = arith.addf %28, %33 : vector<16x16xf32>
      %c2 = arith.constant 2 : index
      %35 = memref.load %arg2[%c2] : memref<98xf32, #tpu.memory_space<smem>>
      %c0_19 = arith.constant 0 : index
      %c0_20 = arith.constant 0 : index
      %c2_21 = arith.constant 2 : index
      %36 = vector.load %arg5[%c0_19, %c0_20, %c2_21] : memref<2x22x22xf32, #tpu.memory_space<vmem>>, vector<1x16x16xf32>
      %37 = vector.shape_cast %36 : vector<1x16x16xf32> to vector<16x16xf32>
      %38 = vector.broadcast %35 : f32 to vector<16x16xf32>
      %39 = arith.mulf %38, %37 : vector<16x16xf32>
      %40 = arith.addf %34, %39 : vector<16x16xf32>
      %c3_22 = arith.constant 3 : index
      %41 = memref.load %arg2[%c3_22] : memref<98xf32, #tpu.memory_space<smem>>
      %c0_23 = arith.constant 0 : index
      %c0_24 = arith.constant 0 : index
      %c3_25 = arith.constant 3 : index
      %42 = vector.load %arg5[%c0_23, %c0_24, %c3_25] : memref<2x22x22xf32, #tpu.memory_space<vmem>>, vector<1x16x16xf32>
      %43 = vector.shape_cast %42 : vector<1x16x16xf32> to vector<16x16xf32>
      %44 = vector.broadcast %41 : f32 to vector<16x16xf32>
      %45 = arith.mulf %44, %43 : vector<16x16xf32>
      %46 = arith.addf %40, %45 : vector<16x16xf32>
      %c4 = arith.constant 4 : index
      %47 = memref.load %arg2[%c4] : memref<98xf32, #tpu.memory_space<smem>>
      %c0_26 = arith.constant 0 : index
      %c0_27 = arith.constant 0 : index
      %c4_28 = arith.constant 4 : index
      %48 = vector.load %arg5[%c0_26, %c0_27, %c4_28] : memref<2x22x22xf32, #tpu.memory_space<vmem>>, vector<1x16x16xf32>
      %49 = vector.shape_cast %48 : vector<1x16x16xf32> to vector<16x16xf32>
      %50 = vector.broadcast %47 : f32 to vector<16x16xf32>
      %51 = arith.mulf %50, %49 : vector<16x16xf32>
      %52 = arith.addf %46, %51 : vector<16x16xf32>
      %c5 = arith.constant 5 : index
      %53 = memref.load %arg2[%c5] : memref<98xf32, #tpu.memory_space<smem>>
      %c0_29 = arith.constant 0 : index
      %c0_30 = arith.constant 0 : index
      %c5_31 = arith.constant 5 : index
      %54 = vector.load %arg5[%c0_29, %c0_30, %c5_31] : memref<2x22x22xf32, #tpu.memory_space<vmem>>, vector<1x16x16xf32>
      %55 = vector.shape_cast %54 : vector<1x16x16xf32> to vector<16x16xf32>
      %56 = vector.broadcast %53 : f32 to vector<16x16xf32>
      %57 = arith.mulf %56, %55 : vector<16x16xf32>
      %58 = arith.addf %52, %57 : vector<16x16xf32>
      %c6 = arith.constant 6 : index
      %59 = memref.load %arg2[%c6] : memref<98xf32, #tpu.memory_space<smem>>
      %c0_32 = arith.constant 0 : index
      %c0_33 = arith.constant 0 : index
      %c6_34 = arith.constant 6 : index
      %60 = vector.load %arg5[%c0_32, %c0_33, %c6_34] : memref<2x22x22xf32, #tpu.memory_space<vmem>>, vector<1x16x16xf32>
      %61 = vector.shape_cast %60 : vector<1x16x16xf32> to vector<16x16xf32>
      %62 = vector.broadcast %59 : f32 to vector<16x16xf32>
      %63 = arith.mulf %62, %61 : vector<16x16xf32>
      %64 = arith.addf %58, %63 : vector<16x16xf32>
      %c7 = arith.constant 7 : index
      %65 = memref.load %arg2[%c7] : memref<98xf32, #tpu.memory_space<smem>>
      %c0_35 = arith.constant 0 : index
      %c1_36 = arith.constant 1 : index
      %c0_37 = arith.constant 0 : index
      %66 = vector.load %arg5[%c0_35, %c1_36, %c0_37] : memref<2x22x22xf32, #tpu.memory_space<vmem>>, vector<1x16x16xf32>
      %67 = vector.shape_cast %66 : vector<1x16x16xf32> to vector<16x16xf32>
      %68 = vector.broadcast %65 : f32 to vector<16x16xf32>
      %69 = arith.mulf %68, %67 : vector<16x16xf32>
      %70 = arith.addf %64, %69 : vector<16x16xf32>
      %c8 = arith.constant 8 : index
      %71 = memref.load %arg2[%c8] : memref<98xf32, #tpu.memory_space<smem>>
      %c0_38 = arith.constant 0 : index
      %c1_39 = arith.constant 1 : index
      %c1_40 = arith.constant 1 : index
      %72 = vector.load %arg5[%c0_38, %c1_39, %c1_40] : memref<2x22x22xf32, #tpu.memory_space<vmem>>, vector<1x16x16xf32>
      %73 = vector.shape_cast %72 : vector<1x16x16xf32> to vector<16x16xf32>
      %74 = vector.broadcast %71 : f32 to vector<16x16xf32>
      %75 = arith.mulf %74, %73 : vector<16x16xf32>
      %76 = arith.addf %70, %75 : vector<16x16xf32>
      %c9 = arith.constant 9 : index
      %77 = memref.load %arg2[%c9] : memref<98xf32, #tpu.memory_space<smem>>
      %c0_41 = arith.constant 0 : index
      %c1_42 = arith.constant 1 : index
      %c2_43 = arith.constant 2 : index
      %78 = vector.load %arg5[%c0_41, %c1_42, %c2_43] : memref<2x22x22xf32, #tpu.memory_space<vmem>>, vector<1x16x16xf32>
      %79 = vector.shape_cast %78 : vector<1x16x16xf32> to vector<16x16xf32>
      %80 = vector.broadcast %77 : f32 to vector<16x16xf32>
      %81 = arith.mulf %80, %79 : vector<16x16xf32>
      %82 = arith.addf %76, %81 : vector<16x16xf32>
      %c10 = arith.constant 10 : index
      %83 = memref.load %arg2[%c10] : memref<98xf32, #tpu.memory_space<smem>>
      %c0_44 = arith.constant 0 : index
      %c1_45 = arith.constant 1 : index
      %c3_46 = arith.constant 3 : index
      %84 = vector.load %arg5[%c0_44, %c1_45, %c3_46] : memref<2x22x22xf32, #tpu.memory_space<vmem>>, vector<1x16x16xf32>
      %85 = vector.shape_cast %84 : vector<1x16x16xf32> to vector<16x16xf32>
      %86 = vector.broadcast %83 : f32 to vector<16x16xf32>
      %87 = arith.mulf %86, %85 : vector<16x16xf32>
      %88 = arith.addf %82, %87 : vector<16x16xf32>
      %c11 = arith.constant 11 : index
      %89 = memref.load %arg2[%c11] : memref<98xf32, #tpu.memory_space<smem>>
      %c0_47 = arith.constant 0 : index
      %c1_48 = arith.constant 1 : index
      %c4_49 = arith.constant 4 : index
      %90 = vector.load %arg5[%c0_47, %c1_48, %c4_49] : memref<2x22x22xf32, #tpu.memory_space<vmem>>, vector<1x16x16xf32>
      %91 = vector.shape_cast %90 : vector<1x16x16xf32> to vector<16x16xf32>
      %92 = vector.broadcast %89 : f32 to vector<16x16xf32>
      %93 = arith.mulf %92, %91 : vector<16x16xf32>
      %94 = arith.addf %88, %93 : vector<16x16xf32>
      %c12 = arith.constant 12 : index
      %95 = memref.load %arg2[%c12] : memref<98xf32, #tpu.memory_space<smem>>
      %c0_50 = arith.constant 0 : index
      %c1_51 = arith.constant 1 : index
      %c5_52 = arith.constant 5 : index
      %96 = vector.load %arg5[%c0_50, %c1_51, %c5_52] : memref<2x22x22xf32, #tpu.memory_space<vmem>>, vector<1x16x16xf32>
      %97 = vector.shape_cast %96 : vector<1x16x16xf32> to vector<16x16xf32>
      %98 = vector.broadcast %95 : f32 to vector<16x16xf32>
      %99 = arith.mulf %98, %97 : vector<16x16xf32>
      %100 = arith.addf %94, %99 : vector<16x16xf32>
      %c13 = arith.constant 13 : index
      %101 = memref.load %arg2[%c13] : memref<98xf32, #tpu.memory_space<smem>>
      %c0_53 = arith.constant 0 : index
      %c1_54 = arith.constant 1 : index
      %c6_55 = arith.constant 6 : index
      %102 = vector.load %arg5[%c0_53, %c1_54, %c6_55] : memref<2x22x22xf32, #tpu.memory_space<vmem>>, vector<1x16x16xf32>
      %103 = vector.shape_cast %102 : vector<1x16x16xf32> to vector<16x16xf32>
      %104 = vector.broadcast %101 : f32 to vector<16x16xf32>
      %105 = arith.mulf %104, %103 : vector<16x16xf32>
      %106 = arith.addf %100, %105 : vector<16x16xf32>
      %c14 = arith.constant 14 : index
      %107 = memref.load %arg2[%c14] : memref<98xf32, #tpu.memory_space<smem>>
      %c0_56 = arith.constant 0 : index
      %c2_57 = arith.constant 2 : index
      %c0_58 = arith.constant 0 : index
      %108 = vector.load %arg5[%c0_56, %c2_57, %c0_58] : memref<2x22x22xf32, #tpu.memory_space<vmem>>, vector<1x16x16xf32>
      %109 = vector.shape_cast %108 : vector<1x16x16xf32> to vector<16x16xf32>
      %110 = vector.broadcast %107 : f32 to vector<16x16xf32>
      %111 = arith.mulf %110, %109 : vector<16x16xf32>
      %112 = arith.addf %106, %111 : vector<16x16xf32>
      %c15 = arith.constant 15 : index
      %113 = memref.load %arg2[%c15] : memref<98xf32, #tpu.memory_space<smem>>
      %c0_59 = arith.constant 0 : index
      %c2_60 = arith.constant 2 : index
      %c1_61 = arith.constant 1 : index
      %114 = vector.load %arg5[%c0_59, %c2_60, %c1_61] : memref<2x22x22xf32, #tpu.memory_space<vmem>>, vector<1x16x16xf32>
      %115 = vector.shape_cast %114 : vector<1x16x16xf32> to vector<16x16xf32>
      %116 = vector.broadcast %113 : f32 to vector<16x16xf32>
      %117 = arith.mulf %116, %115 : vector<16x16xf32>
      %118 = arith.addf %112, %117 : vector<16x16xf32>
      %c16 = arith.constant 16 : index
      %119 = memref.load %arg2[%c16] : memref<98xf32, #tpu.memory_space<smem>>
      %c0_62 = arith.constant 0 : index
      %c2_63 = arith.constant 2 : index
      %c2_64 = arith.constant 2 : index
      %120 = vector.load %arg5[%c0_62, %c2_63, %c2_64] : memref<2x22x22xf32, #tpu.memory_space<vmem>>, vector<1x16x16xf32>
      %121 = vector.shape_cast %120 : vector<1x16x16xf32> to vector<16x16xf32>
      %122 = vector.broadcast %119 : f32 to vector<16x16xf32>
      %123 = arith.mulf %122, %121 : vector<16x16xf32>
      %124 = arith.addf %118, %123 : vector<16x16xf32>
      %c17 = arith.constant 17 : index
      %125 = memref.load %arg2[%c17] : memref<98xf32, #tpu.memory_space<smem>>
      %c0_65 = arith.constant 0 : index
      %c2_66 = arith.constant 2 : index
      %c3_67 = arith.constant 3 : index
      %126 = vector.load %arg5[%c0_65, %c2_66, %c3_67] : memref<2x22x22xf32, #tpu.memory_space<vmem>>, vector<1x16x16xf32>
      %127 = vector.shape_cast %126 : vector<1x16x16xf32> to vector<16x16xf32>
      %128 = vector.broadcast %125 : f32 to vector<16x16xf32>
      %129 = arith.mulf %128, %127 : vector<16x16xf32>
      %130 = arith.addf %124, %129 : vector<16x16xf32>
      %c18 = arith.constant 18 : index
      %131 = memref.load %arg2[%c18] : memref<98xf32, #tpu.memory_space<smem>>
      %c0_68 = arith.constant 0 : index
      %c2_69 = arith.constant 2 : index
      %c4_70 = arith.constant 4 : index
      %132 = vector.load %arg5[%c0_68, %c2_69, %c4_70] : memref<2x22x22xf32, #tpu.memory_space<vmem>>, vector<1x16x16xf32>
      %133 = vector.shape_cast %132 : vector<1x16x16xf32> to vector<16x16xf32>
      %134 = vector.broadcast %131 : f32 to vector<16x16xf32>
      %135 = arith.mulf %134, %133 : vector<16x16xf32>
      %136 = arith.addf %130, %135 : vector<16x16xf32>
      %c19 = arith.constant 19 : index
      %137 = memref.load %arg2[%c19] : memref<98xf32, #tpu.memory_space<smem>>
      %c0_71 = arith.constant 0 : index
      %c2_72 = arith.constant 2 : index
      %c5_73 = arith.constant 5 : index
      %138 = vector.load %arg5[%c0_71, %c2_72, %c5_73] : memref<2x22x22xf32, #tpu.memory_space<vmem>>, vector<1x16x16xf32>
      %139 = vector.shape_cast %138 : vector<1x16x16xf32> to vector<16x16xf32>
      %140 = vector.broadcast %137 : f32 to vector<16x16xf32>
      %141 = arith.mulf %140, %139 : vector<16x16xf32>
      %142 = arith.addf %136, %141 : vector<16x16xf32>
      %c20 = arith.constant 20 : index
      %143 = memref.load %arg2[%c20] : memref<98xf32, #tpu.memory_space<smem>>
      %c0_74 = arith.constant 0 : index
      %c2_75 = arith.constant 2 : index
      %c6_76 = arith.constant 6 : index
      %144 = vector.load %arg5[%c0_74, %c2_75, %c6_76] : memref<2x22x22xf32, #tpu.memory_space<vmem>>, vector<1x16x16xf32>
      %145 = vector.shape_cast %144 : vector<1x16x16xf32> to vector<16x16xf32>
      %146 = vector.broadcast %143 : f32 to vector<16x16xf32>
      %147 = arith.mulf %146, %145 : vector<16x16xf32>
      %148 = arith.addf %142, %147 : vector<16x16xf32>
      %c21 = arith.constant 21 : index
      %149 = memref.load %arg2[%c21] : memref<98xf32, #tpu.memory_space<smem>>
      %c0_77 = arith.constant 0 : index
      %c3_78 = arith.constant 3 : index
      %c0_79 = arith.constant 0 : index
      %150 = vector.load %arg5[%c0_77, %c3_78, %c0_79] : memref<2x22x22xf32, #tpu.memory_space<vmem>>, vector<1x16x16xf32>
      %151 = vector.shape_cast %150 : vector<1x16x16xf32> to vector<16x16xf32>
      %152 = vector.broadcast %149 : f32 to vector<16x16xf32>
      %153 = arith.mulf %152, %151 : vector<16x16xf32>
      %154 = arith.addf %148, %153 : vector<16x16xf32>
      %c22 = arith.constant 22 : index
      %155 = memref.load %arg2[%c22] : memref<98xf32, #tpu.memory_space<smem>>
      %c0_80 = arith.constant 0 : index
      %c3_81 = arith.constant 3 : index
      %c1_82 = arith.constant 1 : index
      %156 = vector.load %arg5[%c0_80, %c3_81, %c1_82] : memref<2x22x22xf32, #tpu.memory_space<vmem>>, vector<1x16x16xf32>
      %157 = vector.shape_cast %156 : vector<1x16x16xf32> to vector<16x16xf32>
      %158 = vector.broadcast %155 : f32 to vector<16x16xf32>
      %159 = arith.mulf %158, %157 : vector<16x16xf32>
      %160 = arith.addf %154, %159 : vector<16x16xf32>
      %c23 = arith.constant 23 : index
      %161 = memref.load %arg2[%c23] : memref<98xf32, #tpu.memory_space<smem>>
      %c0_83 = arith.constant 0 : index
      %c3_84 = arith.constant 3 : index
      %c2_85 = arith.constant 2 : index
      %162 = vector.load %arg5[%c0_83, %c3_84, %c2_85] : memref<2x22x22xf32, #tpu.memory_space<vmem>>, vector<1x16x16xf32>
      %163 = vector.shape_cast %162 : vector<1x16x16xf32> to vector<16x16xf32>
      %164 = vector.broadcast %161 : f32 to vector<16x16xf32>
      %165 = arith.mulf %164, %163 : vector<16x16xf32>
      %166 = arith.addf %160, %165 : vector<16x16xf32>
      %c24 = arith.constant 24 : index
      %167 = memref.load %arg2[%c24] : memref<98xf32, #tpu.memory_space<smem>>
      %c0_86 = arith.constant 0 : index
      %c3_87 = arith.constant 3 : index
      %c3_88 = arith.constant 3 : index
      %168 = vector.load %arg5[%c0_86, %c3_87, %c3_88] : memref<2x22x22xf32, #tpu.memory_space<vmem>>, vector<1x16x16xf32>
      %169 = vector.shape_cast %168 : vector<1x16x16xf32> to vector<16x16xf32>
      %170 = vector.broadcast %167 : f32 to vector<16x16xf32>
      %171 = arith.mulf %170, %169 : vector<16x16xf32>
      %172 = arith.addf %166, %171 : vector<16x16xf32>
      %c25 = arith.constant 25 : index
      %173 = memref.load %arg2[%c25] : memref<98xf32, #tpu.memory_space<smem>>
      %c0_89 = arith.constant 0 : index
      %c3_90 = arith.constant 3 : index
      %c4_91 = arith.constant 4 : index
      %174 = vector.load %arg5[%c0_89, %c3_90, %c4_91] : memref<2x22x22xf32, #tpu.memory_space<vmem>>, vector<1x16x16xf32>
      %175 = vector.shape_cast %174 : vector<1x16x16xf32> to vector<16x16xf32>
      %176 = vector.broadcast %173 : f32 to vector<16x16xf32>
      %177 = arith.mulf %176, %175 : vector<16x16xf32>
      %178 = arith.addf %172, %177 : vector<16x16xf32>
      %c26 = arith.constant 26 : index
      %179 = memref.load %arg2[%c26] : memref<98xf32, #tpu.memory_space<smem>>
      %c0_92 = arith.constant 0 : index
      %c3_93 = arith.constant 3 : index
      %c5_94 = arith.constant 5 : index
      %180 = vector.load %arg5[%c0_92, %c3_93, %c5_94] : memref<2x22x22xf32, #tpu.memory_space<vmem>>, vector<1x16x16xf32>
      %181 = vector.shape_cast %180 : vector<1x16x16xf32> to vector<16x16xf32>
      %182 = vector.broadcast %179 : f32 to vector<16x16xf32>
      %183 = arith.mulf %182, %181 : vector<16x16xf32>
      %184 = arith.addf %178, %183 : vector<16x16xf32>
      %c27 = arith.constant 27 : index
      %185 = memref.load %arg2[%c27] : memref<98xf32, #tpu.memory_space<smem>>
      %c0_95 = arith.constant 0 : index
      %c3_96 = arith.constant 3 : index
      %c6_97 = arith.constant 6 : index
      %186 = vector.load %arg5[%c0_95, %c3_96, %c6_97] : memref<2x22x22xf32, #tpu.memory_space<vmem>>, vector<1x16x16xf32>
      %187 = vector.shape_cast %186 : vector<1x16x16xf32> to vector<16x16xf32>
      %188 = vector.broadcast %185 : f32 to vector<16x16xf32>
      %189 = arith.mulf %188, %187 : vector<16x16xf32>
      %190 = arith.addf %184, %189 : vector<16x16xf32>
      %c28 = arith.constant 28 : index
      %191 = memref.load %arg2[%c28] : memref<98xf32, #tpu.memory_space<smem>>
      %c0_98 = arith.constant 0 : index
      %c4_99 = arith.constant 4 : index
      %c0_100 = arith.constant 0 : index
      %192 = vector.load %arg5[%c0_98, %c4_99, %c0_100] : memref<2x22x22xf32, #tpu.memory_space<vmem>>, vector<1x16x16xf32>
      %193 = vector.shape_cast %192 : vector<1x16x16xf32> to vector<16x16xf32>
      %194 = vector.broadcast %191 : f32 to vector<16x16xf32>
      %195 = arith.mulf %194, %193 : vector<16x16xf32>
      %196 = arith.addf %190, %195 : vector<16x16xf32>
      %c29 = arith.constant 29 : index
      %197 = memref.load %arg2[%c29] : memref<98xf32, #tpu.memory_space<smem>>
      %c0_101 = arith.constant 0 : index
      %c4_102 = arith.constant 4 : index
      %c1_103 = arith.constant 1 : index
      %198 = vector.load %arg5[%c0_101, %c4_102, %c1_103] : memref<2x22x22xf32, #tpu.memory_space<vmem>>, vector<1x16x16xf32>
      %199 = vector.shape_cast %198 : vector<1x16x16xf32> to vector<16x16xf32>
      %200 = vector.broadcast %197 : f32 to vector<16x16xf32>
      %201 = arith.mulf %200, %199 : vector<16x16xf32>
      %202 = arith.addf %196, %201 : vector<16x16xf32>
      %c30 = arith.constant 30 : index
      %203 = memref.load %arg2[%c30] : memref<98xf32, #tpu.memory_space<smem>>
      %c0_104 = arith.constant 0 : index
      %c4_105 = arith.constant 4 : index
      %c2_106 = arith.constant 2 : index
      %204 = vector.load %arg5[%c0_104, %c4_105, %c2_106] : memref<2x22x22xf32, #tpu.memory_space<vmem>>, vector<1x16x16xf32>
      %205 = vector.shape_cast %204 : vector<1x16x16xf32> to vector<16x16xf32>
      %206 = vector.broadcast %203 : f32 to vector<16x16xf32>
      %207 = arith.mulf %206, %205 : vector<16x16xf32>
      %208 = arith.addf %202, %207 : vector<16x16xf32>
      %c31 = arith.constant 31 : index
      %209 = memref.load %arg2[%c31] : memref<98xf32, #tpu.memory_space<smem>>
      %c0_107 = arith.constant 0 : index
      %c4_108 = arith.constant 4 : index
      %c3_109 = arith.constant 3 : index
      %210 = vector.load %arg5[%c0_107, %c4_108, %c3_109] : memref<2x22x22xf32, #tpu.memory_space<vmem>>, vector<1x16x16xf32>
      %211 = vector.shape_cast %210 : vector<1x16x16xf32> to vector<16x16xf32>
      %212 = vector.broadcast %209 : f32 to vector<16x16xf32>
      %213 = arith.mulf %212, %211 : vector<16x16xf32>
      %214 = arith.addf %208, %213 : vector<16x16xf32>
      %c32 = arith.constant 32 : index
      %215 = memref.load %arg2[%c32] : memref<98xf32, #tpu.memory_space<smem>>
      %c0_110 = arith.constant 0 : index
      %c4_111 = arith.constant 4 : index
      %c4_112 = arith.constant 4 : index
      %216 = vector.load %arg5[%c0_110, %c4_111, %c4_112] : memref<2x22x22xf32, #tpu.memory_space<vmem>>, vector<1x16x16xf32>
      %217 = vector.shape_cast %216 : vector<1x16x16xf32> to vector<16x16xf32>
      %218 = vector.broadcast %215 : f32 to vector<16x16xf32>
      %219 = arith.mulf %218, %217 : vector<16x16xf32>
      %220 = arith.addf %214, %219 : vector<16x16xf32>
      %c33 = arith.constant 33 : index
      %221 = memref.load %arg2[%c33] : memref<98xf32, #tpu.memory_space<smem>>
      %c0_113 = arith.constant 0 : index
      %c4_114 = arith.constant 4 : index
      %c5_115 = arith.constant 5 : index
      %222 = vector.load %arg5[%c0_113, %c4_114, %c5_115] : memref<2x22x22xf32, #tpu.memory_space<vmem>>, vector<1x16x16xf32>
      %223 = vector.shape_cast %222 : vector<1x16x16xf32> to vector<16x16xf32>
      %224 = vector.broadcast %221 : f32 to vector<16x16xf32>
      %225 = arith.mulf %224, %223 : vector<16x16xf32>
      %226 = arith.addf %220, %225 : vector<16x16xf32>
      %c34 = arith.constant 34 : index
      %227 = memref.load %arg2[%c34] : memref<98xf32, #tpu.memory_space<smem>>
      %c0_116 = arith.constant 0 : index
      %c4_117 = arith.constant 4 : index
      %c6_118 = arith.constant 6 : index
      %228 = vector.load %arg5[%c0_116, %c4_117, %c6_118] : memref<2x22x22xf32, #tpu.memory_space<vmem>>, vector<1x16x16xf32>
      %229 = vector.shape_cast %228 : vector<1x16x16xf32> to vector<16x16xf32>
      %230 = vector.broadcast %227 : f32 to vector<16x16xf32>
      %231 = arith.mulf %230, %229 : vector<16x16xf32>
      %232 = arith.addf %226, %231 : vector<16x16xf32>
      %c35 = arith.constant 35 : index
      %233 = memref.load %arg2[%c35] : memref<98xf32, #tpu.memory_space<smem>>
      %c0_119 = arith.constant 0 : index
      %c5_120 = arith.constant 5 : index
      %c0_121 = arith.constant 0 : index
      %234 = vector.load %arg5[%c0_119, %c5_120, %c0_121] : memref<2x22x22xf32, #tpu.memory_space<vmem>>, vector<1x16x16xf32>
      %235 = vector.shape_cast %234 : vector<1x16x16xf32> to vector<16x16xf32>
      %236 = vector.broadcast %233 : f32 to vector<16x16xf32>
      %237 = arith.mulf %236, %235 : vector<16x16xf32>
      %238 = arith.addf %232, %237 : vector<16x16xf32>
      %c36 = arith.constant 36 : index
      %239 = memref.load %arg2[%c36] : memref<98xf32, #tpu.memory_space<smem>>
      %c0_122 = arith.constant 0 : index
      %c5_123 = arith.constant 5 : index
      %c1_124 = arith.constant 1 : index
      %240 = vector.load %arg5[%c0_122, %c5_123, %c1_124] : memref<2x22x22xf32, #tpu.memory_space<vmem>>, vector<1x16x16xf32>
      %241 = vector.shape_cast %240 : vector<1x16x16xf32> to vector<16x16xf32>
      %242 = vector.broadcast %239 : f32 to vector<16x16xf32>
      %243 = arith.mulf %242, %241 : vector<16x16xf32>
      %244 = arith.addf %238, %243 : vector<16x16xf32>
      %c37 = arith.constant 37 : index
      %245 = memref.load %arg2[%c37] : memref<98xf32, #tpu.memory_space<smem>>
      %c0_125 = arith.constant 0 : index
      %c5_126 = arith.constant 5 : index
      %c2_127 = arith.constant 2 : index
      %246 = vector.load %arg5[%c0_125, %c5_126, %c2_127] : memref<2x22x22xf32, #tpu.memory_space<vmem>>, vector<1x16x16xf32>
      %247 = vector.shape_cast %246 : vector<1x16x16xf32> to vector<16x16xf32>
      %248 = vector.broadcast %245 : f32 to vector<16x16xf32>
      %249 = arith.mulf %248, %247 : vector<16x16xf32>
      %250 = arith.addf %244, %249 : vector<16x16xf32>
      %c38 = arith.constant 38 : index
      %251 = memref.load %arg2[%c38] : memref<98xf32, #tpu.memory_space<smem>>
      %c0_128 = arith.constant 0 : index
      %c5_129 = arith.constant 5 : index
      %c3_130 = arith.constant 3 : index
      %252 = vector.load %arg5[%c0_128, %c5_129, %c3_130] : memref<2x22x22xf32, #tpu.memory_space<vmem>>, vector<1x16x16xf32>
      %253 = vector.shape_cast %252 : vector<1x16x16xf32> to vector<16x16xf32>
      %254 = vector.broadcast %251 : f32 to vector<16x16xf32>
      %255 = arith.mulf %254, %253 : vector<16x16xf32>
      %256 = arith.addf %250, %255 : vector<16x16xf32>
      %c39 = arith.constant 39 : index
      %257 = memref.load %arg2[%c39] : memref<98xf32, #tpu.memory_space<smem>>
      %c0_131 = arith.constant 0 : index
      %c5_132 = arith.constant 5 : index
      %c4_133 = arith.constant 4 : index
      %258 = vector.load %arg5[%c0_131, %c5_132, %c4_133] : memref<2x22x22xf32, #tpu.memory_space<vmem>>, vector<1x16x16xf32>
      %259 = vector.shape_cast %258 : vector<1x16x16xf32> to vector<16x16xf32>
      %260 = vector.broadcast %257 : f32 to vector<16x16xf32>
      %261 = arith.mulf %260, %259 : vector<16x16xf32>
      %262 = arith.addf %256, %261 : vector<16x16xf32>
      %c40 = arith.constant 40 : index
      %263 = memref.load %arg2[%c40] : memref<98xf32, #tpu.memory_space<smem>>
      %c0_134 = arith.constant 0 : index
      %c5_135 = arith.constant 5 : index
      %c5_136 = arith.constant 5 : index
      %264 = vector.load %arg5[%c0_134, %c5_135, %c5_136] : memref<2x22x22xf32, #tpu.memory_space<vmem>>, vector<1x16x16xf32>
      %265 = vector.shape_cast %264 : vector<1x16x16xf32> to vector<16x16xf32>
      %266 = vector.broadcast %263 : f32 to vector<16x16xf32>
      %267 = arith.mulf %266, %265 : vector<16x16xf32>
      %268 = arith.addf %262, %267 : vector<16x16xf32>
      %c41 = arith.constant 41 : index
      %269 = memref.load %arg2[%c41] : memref<98xf32, #tpu.memory_space<smem>>
      %c0_137 = arith.constant 0 : index
      %c5_138 = arith.constant 5 : index
      %c6_139 = arith.constant 6 : index
      %270 = vector.load %arg5[%c0_137, %c5_138, %c6_139] : memref<2x22x22xf32, #tpu.memory_space<vmem>>, vector<1x16x16xf32>
      %271 = vector.shape_cast %270 : vector<1x16x16xf32> to vector<16x16xf32>
      %272 = vector.broadcast %269 : f32 to vector<16x16xf32>
      %273 = arith.mulf %272, %271 : vector<16x16xf32>
      %274 = arith.addf %268, %273 : vector<16x16xf32>
      %c42 = arith.constant 42 : index
      %275 = memref.load %arg2[%c42] : memref<98xf32, #tpu.memory_space<smem>>
      %c0_140 = arith.constant 0 : index
      %c6_141 = arith.constant 6 : index
      %c0_142 = arith.constant 0 : index
      %276 = vector.load %arg5[%c0_140, %c6_141, %c0_142] : memref<2x22x22xf32, #tpu.memory_space<vmem>>, vector<1x16x16xf32>
      %277 = vector.shape_cast %276 : vector<1x16x16xf32> to vector<16x16xf32>
      %278 = vector.broadcast %275 : f32 to vector<16x16xf32>
      %279 = arith.mulf %278, %277 : vector<16x16xf32>
      %280 = arith.addf %274, %279 : vector<16x16xf32>
      %c43 = arith.constant 43 : index
      %281 = memref.load %arg2[%c43] : memref<98xf32, #tpu.memory_space<smem>>
      %c0_143 = arith.constant 0 : index
      %c6_144 = arith.constant 6 : index
      %c1_145 = arith.constant 1 : index
      %282 = vector.load %arg5[%c0_143, %c6_144, %c1_145] : memref<2x22x22xf32, #tpu.memory_space<vmem>>, vector<1x16x16xf32>
      %283 = vector.shape_cast %282 : vector<1x16x16xf32> to vector<16x16xf32>
      %284 = vector.broadcast %281 : f32 to vector<16x16xf32>
      %285 = arith.mulf %284, %283 : vector<16x16xf32>
      %286 = arith.addf %280, %285 : vector<16x16xf32>
      %c44 = arith.constant 44 : index
      %287 = memref.load %arg2[%c44] : memref<98xf32, #tpu.memory_space<smem>>
      %c0_146 = arith.constant 0 : index
      %c6_147 = arith.constant 6 : index
      %c2_148 = arith.constant 2 : index
      %288 = vector.load %arg5[%c0_146, %c6_147, %c2_148] : memref<2x22x22xf32, #tpu.memory_space<vmem>>, vector<1x16x16xf32>
      %289 = vector.shape_cast %288 : vector<1x16x16xf32> to vector<16x16xf32>
      %290 = vector.broadcast %287 : f32 to vector<16x16xf32>
      %291 = arith.mulf %290, %289 : vector<16x16xf32>
      %292 = arith.addf %286, %291 : vector<16x16xf32>
      %c45 = arith.constant 45 : index
      %293 = memref.load %arg2[%c45] : memref<98xf32, #tpu.memory_space<smem>>
      %c0_149 = arith.constant 0 : index
      %c6_150 = arith.constant 6 : index
      %c3_151 = arith.constant 3 : index
      %294 = vector.load %arg5[%c0_149, %c6_150, %c3_151] : memref<2x22x22xf32, #tpu.memory_space<vmem>>, vector<1x16x16xf32>
      %295 = vector.shape_cast %294 : vector<1x16x16xf32> to vector<16x16xf32>
      %296 = vector.broadcast %293 : f32 to vector<16x16xf32>
      %297 = arith.mulf %296, %295 : vector<16x16xf32>
      %298 = arith.addf %292, %297 : vector<16x16xf32>
      %c46 = arith.constant 46 : index
      %299 = memref.load %arg2[%c46] : memref<98xf32, #tpu.memory_space<smem>>
      %c0_152 = arith.constant 0 : index
      %c6_153 = arith.constant 6 : index
      %c4_154 = arith.constant 4 : index
      %300 = vector.load %arg5[%c0_152, %c6_153, %c4_154] : memref<2x22x22xf32, #tpu.memory_space<vmem>>, vector<1x16x16xf32>
      %301 = vector.shape_cast %300 : vector<1x16x16xf32> to vector<16x16xf32>
      %302 = vector.broadcast %299 : f32 to vector<16x16xf32>
      %303 = arith.mulf %302, %301 : vector<16x16xf32>
      %304 = arith.addf %298, %303 : vector<16x16xf32>
      %c47 = arith.constant 47 : index
      %305 = memref.load %arg2[%c47] : memref<98xf32, #tpu.memory_space<smem>>
      %c0_155 = arith.constant 0 : index
      %c6_156 = arith.constant 6 : index
      %c5_157 = arith.constant 5 : index
      %306 = vector.load %arg5[%c0_155, %c6_156, %c5_157] : memref<2x22x22xf32, #tpu.memory_space<vmem>>, vector<1x16x16xf32>
      %307 = vector.shape_cast %306 : vector<1x16x16xf32> to vector<16x16xf32>
      %308 = vector.broadcast %305 : f32 to vector<16x16xf32>
      %309 = arith.mulf %308, %307 : vector<16x16xf32>
      %310 = arith.addf %304, %309 : vector<16x16xf32>
      %c48 = arith.constant 48 : index
      %311 = memref.load %arg2[%c48] : memref<98xf32, #tpu.memory_space<smem>>
      %c0_158 = arith.constant 0 : index
      %c6_159 = arith.constant 6 : index
      %c6_160 = arith.constant 6 : index
      %312 = vector.load %arg5[%c0_158, %c6_159, %c6_160] : memref<2x22x22xf32, #tpu.memory_space<vmem>>, vector<1x16x16xf32>
      %313 = vector.shape_cast %312 : vector<1x16x16xf32> to vector<16x16xf32>
      %314 = vector.broadcast %311 : f32 to vector<16x16xf32>
      %315 = arith.mulf %314, %313 : vector<16x16xf32>
      %316 = arith.addf %310, %315 : vector<16x16xf32>
      %c49 = arith.constant 49 : index
      %317 = memref.load %arg2[%c49] : memref<98xf32, #tpu.memory_space<smem>>
      %c1_161 = arith.constant 1 : index
      %c0_162 = arith.constant 0 : index
      %c0_163 = arith.constant 0 : index
      %318 = vector.load %arg5[%c1_161, %c0_162, %c0_163] : memref<2x22x22xf32, #tpu.memory_space<vmem>>, vector<1x16x16xf32>
      %319 = vector.shape_cast %318 : vector<1x16x16xf32> to vector<16x16xf32>
      %320 = vector.broadcast %317 : f32 to vector<16x16xf32>
      %321 = arith.mulf %320, %319 : vector<16x16xf32>
      %322 = arith.addf %316, %321 : vector<16x16xf32>
      %c50 = arith.constant 50 : index
      %323 = memref.load %arg2[%c50] : memref<98xf32, #tpu.memory_space<smem>>
      %c1_164 = arith.constant 1 : index
      %c0_165 = arith.constant 0 : index
      %c1_166 = arith.constant 1 : index
      %324 = vector.load %arg5[%c1_164, %c0_165, %c1_166] : memref<2x22x22xf32, #tpu.memory_space<vmem>>, vector<1x16x16xf32>
      %325 = vector.shape_cast %324 : vector<1x16x16xf32> to vector<16x16xf32>
      %326 = vector.broadcast %323 : f32 to vector<16x16xf32>
      %327 = arith.mulf %326, %325 : vector<16x16xf32>
      %328 = arith.addf %322, %327 : vector<16x16xf32>
      %c51 = arith.constant 51 : index
      %329 = memref.load %arg2[%c51] : memref<98xf32, #tpu.memory_space<smem>>
      %c1_167 = arith.constant 1 : index
      %c0_168 = arith.constant 0 : index
      %c2_169 = arith.constant 2 : index
      %330 = vector.load %arg5[%c1_167, %c0_168, %c2_169] : memref<2x22x22xf32, #tpu.memory_space<vmem>>, vector<1x16x16xf32>
      %331 = vector.shape_cast %330 : vector<1x16x16xf32> to vector<16x16xf32>
      %332 = vector.broadcast %329 : f32 to vector<16x16xf32>
      %333 = arith.mulf %332, %331 : vector<16x16xf32>
      %334 = arith.addf %328, %333 : vector<16x16xf32>
      %c52 = arith.constant 52 : index
      %335 = memref.load %arg2[%c52] : memref<98xf32, #tpu.memory_space<smem>>
      %c1_170 = arith.constant 1 : index
      %c0_171 = arith.constant 0 : index
      %c3_172 = arith.constant 3 : index
      %336 = vector.load %arg5[%c1_170, %c0_171, %c3_172] : memref<2x22x22xf32, #tpu.memory_space<vmem>>, vector<1x16x16xf32>
      %337 = vector.shape_cast %336 : vector<1x16x16xf32> to vector<16x16xf32>
      %338 = vector.broadcast %335 : f32 to vector<16x16xf32>
      %339 = arith.mulf %338, %337 : vector<16x16xf32>
      %340 = arith.addf %334, %339 : vector<16x16xf32>
      %c53 = arith.constant 53 : index
      %341 = memref.load %arg2[%c53] : memref<98xf32, #tpu.memory_space<smem>>
      %c1_173 = arith.constant 1 : index
      %c0_174 = arith.constant 0 : index
      %c4_175 = arith.constant 4 : index
      %342 = vector.load %arg5[%c1_173, %c0_174, %c4_175] : memref<2x22x22xf32, #tpu.memory_space<vmem>>, vector<1x16x16xf32>
      %343 = vector.shape_cast %342 : vector<1x16x16xf32> to vector<16x16xf32>
      %344 = vector.broadcast %341 : f32 to vector<16x16xf32>
      %345 = arith.mulf %344, %343 : vector<16x16xf32>
      %346 = arith.addf %340, %345 : vector<16x16xf32>
      %c54 = arith.constant 54 : index
      %347 = memref.load %arg2[%c54] : memref<98xf32, #tpu.memory_space<smem>>
      %c1_176 = arith.constant 1 : index
      %c0_177 = arith.constant 0 : index
      %c5_178 = arith.constant 5 : index
      %348 = vector.load %arg5[%c1_176, %c0_177, %c5_178] : memref<2x22x22xf32, #tpu.memory_space<vmem>>, vector<1x16x16xf32>
      %349 = vector.shape_cast %348 : vector<1x16x16xf32> to vector<16x16xf32>
      %350 = vector.broadcast %347 : f32 to vector<16x16xf32>
      %351 = arith.mulf %350, %349 : vector<16x16xf32>
      %352 = arith.addf %346, %351 : vector<16x16xf32>
      %c55 = arith.constant 55 : index
      %353 = memref.load %arg2[%c55] : memref<98xf32, #tpu.memory_space<smem>>
      %c1_179 = arith.constant 1 : index
      %c0_180 = arith.constant 0 : index
      %c6_181 = arith.constant 6 : index
      %354 = vector.load %arg5[%c1_179, %c0_180, %c6_181] : memref<2x22x22xf32, #tpu.memory_space<vmem>>, vector<1x16x16xf32>
      %355 = vector.shape_cast %354 : vector<1x16x16xf32> to vector<16x16xf32>
      %356 = vector.broadcast %353 : f32 to vector<16x16xf32>
      %357 = arith.mulf %356, %355 : vector<16x16xf32>
      %358 = arith.addf %352, %357 : vector<16x16xf32>
      %c56 = arith.constant 56 : index
      %359 = memref.load %arg2[%c56] : memref<98xf32, #tpu.memory_space<smem>>
      %c1_182 = arith.constant 1 : index
      %c1_183 = arith.constant 1 : index
      %c0_184 = arith.constant 0 : index
      %360 = vector.load %arg5[%c1_182, %c1_183, %c0_184] : memref<2x22x22xf32, #tpu.memory_space<vmem>>, vector<1x16x16xf32>
      %361 = vector.shape_cast %360 : vector<1x16x16xf32> to vector<16x16xf32>
      %362 = vector.broadcast %359 : f32 to vector<16x16xf32>
      %363 = arith.mulf %362, %361 : vector<16x16xf32>
      %364 = arith.addf %358, %363 : vector<16x16xf32>
      %c57 = arith.constant 57 : index
      %365 = memref.load %arg2[%c57] : memref<98xf32, #tpu.memory_space<smem>>
      %c1_185 = arith.constant 1 : index
      %c1_186 = arith.constant 1 : index
      %c1_187 = arith.constant 1 : index
      %366 = vector.load %arg5[%c1_185, %c1_186, %c1_187] : memref<2x22x22xf32, #tpu.memory_space<vmem>>, vector<1x16x16xf32>
      %367 = vector.shape_cast %366 : vector<1x16x16xf32> to vector<16x16xf32>
      %368 = vector.broadcast %365 : f32 to vector<16x16xf32>
      %369 = arith.mulf %368, %367 : vector<16x16xf32>
      %370 = arith.addf %364, %369 : vector<16x16xf32>
      %c58 = arith.constant 58 : index
      %371 = memref.load %arg2[%c58] : memref<98xf32, #tpu.memory_space<smem>>
      %c1_188 = arith.constant 1 : index
      %c1_189 = arith.constant 1 : index
      %c2_190 = arith.constant 2 : index
      %372 = vector.load %arg5[%c1_188, %c1_189, %c2_190] : memref<2x22x22xf32, #tpu.memory_space<vmem>>, vector<1x16x16xf32>
      %373 = vector.shape_cast %372 : vector<1x16x16xf32> to vector<16x16xf32>
      %374 = vector.broadcast %371 : f32 to vector<16x16xf32>
      %375 = arith.mulf %374, %373 : vector<16x16xf32>
      %376 = arith.addf %370, %375 : vector<16x16xf32>
      %c59 = arith.constant 59 : index
      %377 = memref.load %arg2[%c59] : memref<98xf32, #tpu.memory_space<smem>>
      %c1_191 = arith.constant 1 : index
      %c1_192 = arith.constant 1 : index
      %c3_193 = arith.constant 3 : index
      %378 = vector.load %arg5[%c1_191, %c1_192, %c3_193] : memref<2x22x22xf32, #tpu.memory_space<vmem>>, vector<1x16x16xf32>
      %379 = vector.shape_cast %378 : vector<1x16x16xf32> to vector<16x16xf32>
      %380 = vector.broadcast %377 : f32 to vector<16x16xf32>
      %381 = arith.mulf %380, %379 : vector<16x16xf32>
      %382 = arith.addf %376, %381 : vector<16x16xf32>
      %c60 = arith.constant 60 : index
      %383 = memref.load %arg2[%c60] : memref<98xf32, #tpu.memory_space<smem>>
      %c1_194 = arith.constant 1 : index
      %c1_195 = arith.constant 1 : index
      %c4_196 = arith.constant 4 : index
      %384 = vector.load %arg5[%c1_194, %c1_195, %c4_196] : memref<2x22x22xf32, #tpu.memory_space<vmem>>, vector<1x16x16xf32>
      %385 = vector.shape_cast %384 : vector<1x16x16xf32> to vector<16x16xf32>
      %386 = vector.broadcast %383 : f32 to vector<16x16xf32>
      %387 = arith.mulf %386, %385 : vector<16x16xf32>
      %388 = arith.addf %382, %387 : vector<16x16xf32>
      %c61 = arith.constant 61 : index
      %389 = memref.load %arg2[%c61] : memref<98xf32, #tpu.memory_space<smem>>
      %c1_197 = arith.constant 1 : index
      %c1_198 = arith.constant 1 : index
      %c5_199 = arith.constant 5 : index
      %390 = vector.load %arg5[%c1_197, %c1_198, %c5_199] : memref<2x22x22xf32, #tpu.memory_space<vmem>>, vector<1x16x16xf32>
      %391 = vector.shape_cast %390 : vector<1x16x16xf32> to vector<16x16xf32>
      %392 = vector.broadcast %389 : f32 to vector<16x16xf32>
      %393 = arith.mulf %392, %391 : vector<16x16xf32>
      %394 = arith.addf %388, %393 : vector<16x16xf32>
      %c62 = arith.constant 62 : index
      %395 = memref.load %arg2[%c62] : memref<98xf32, #tpu.memory_space<smem>>
      %c1_200 = arith.constant 1 : index
      %c1_201 = arith.constant 1 : index
      %c6_202 = arith.constant 6 : index
      %396 = vector.load %arg5[%c1_200, %c1_201, %c6_202] : memref<2x22x22xf32, #tpu.memory_space<vmem>>, vector<1x16x16xf32>
      %397 = vector.shape_cast %396 : vector<1x16x16xf32> to vector<16x16xf32>
      %398 = vector.broadcast %395 : f32 to vector<16x16xf32>
      %399 = arith.mulf %398, %397 : vector<16x16xf32>
      %400 = arith.addf %394, %399 : vector<16x16xf32>
      %c63 = arith.constant 63 : index
      %401 = memref.load %arg2[%c63] : memref<98xf32, #tpu.memory_space<smem>>
      %c1_203 = arith.constant 1 : index
      %c2_204 = arith.constant 2 : index
      %c0_205 = arith.constant 0 : index
      %402 = vector.load %arg5[%c1_203, %c2_204, %c0_205] : memref<2x22x22xf32, #tpu.memory_space<vmem>>, vector<1x16x16xf32>
      %403 = vector.shape_cast %402 : vector<1x16x16xf32> to vector<16x16xf32>
      %404 = vector.broadcast %401 : f32 to vector<16x16xf32>
      %405 = arith.mulf %404, %403 : vector<16x16xf32>
      %406 = arith.addf %400, %405 : vector<16x16xf32>
      %c64 = arith.constant 64 : index
      %407 = memref.load %arg2[%c64] : memref<98xf32, #tpu.memory_space<smem>>
      %c1_206 = arith.constant 1 : index
      %c2_207 = arith.constant 2 : index
      %c1_208 = arith.constant 1 : index
      %408 = vector.load %arg5[%c1_206, %c2_207, %c1_208] : memref<2x22x22xf32, #tpu.memory_space<vmem>>, vector<1x16x16xf32>
      %409 = vector.shape_cast %408 : vector<1x16x16xf32> to vector<16x16xf32>
      %410 = vector.broadcast %407 : f32 to vector<16x16xf32>
      %411 = arith.mulf %410, %409 : vector<16x16xf32>
      %412 = arith.addf %406, %411 : vector<16x16xf32>
      %c65 = arith.constant 65 : index
      %413 = memref.load %arg2[%c65] : memref<98xf32, #tpu.memory_space<smem>>
      %c1_209 = arith.constant 1 : index
      %c2_210 = arith.constant 2 : index
      %c2_211 = arith.constant 2 : index
      %414 = vector.load %arg5[%c1_209, %c2_210, %c2_211] : memref<2x22x22xf32, #tpu.memory_space<vmem>>, vector<1x16x16xf32>
      %415 = vector.shape_cast %414 : vector<1x16x16xf32> to vector<16x16xf32>
      %416 = vector.broadcast %413 : f32 to vector<16x16xf32>
      %417 = arith.mulf %416, %415 : vector<16x16xf32>
      %418 = arith.addf %412, %417 : vector<16x16xf32>
      %c66 = arith.constant 66 : index
      %419 = memref.load %arg2[%c66] : memref<98xf32, #tpu.memory_space<smem>>
      %c1_212 = arith.constant 1 : index
      %c2_213 = arith.constant 2 : index
      %c3_214 = arith.constant 3 : index
      %420 = vector.load %arg5[%c1_212, %c2_213, %c3_214] : memref<2x22x22xf32, #tpu.memory_space<vmem>>, vector<1x16x16xf32>
      %421 = vector.shape_cast %420 : vector<1x16x16xf32> to vector<16x16xf32>
      %422 = vector.broadcast %419 : f32 to vector<16x16xf32>
      %423 = arith.mulf %422, %421 : vector<16x16xf32>
      %424 = arith.addf %418, %423 : vector<16x16xf32>
      %c67 = arith.constant 67 : index
      %425 = memref.load %arg2[%c67] : memref<98xf32, #tpu.memory_space<smem>>
      %c1_215 = arith.constant 1 : index
      %c2_216 = arith.constant 2 : index
      %c4_217 = arith.constant 4 : index
      %426 = vector.load %arg5[%c1_215, %c2_216, %c4_217] : memref<2x22x22xf32, #tpu.memory_space<vmem>>, vector<1x16x16xf32>
      %427 = vector.shape_cast %426 : vector<1x16x16xf32> to vector<16x16xf32>
      %428 = vector.broadcast %425 : f32 to vector<16x16xf32>
      %429 = arith.mulf %428, %427 : vector<16x16xf32>
      %430 = arith.addf %424, %429 : vector<16x16xf32>
      %c68 = arith.constant 68 : index
      %431 = memref.load %arg2[%c68] : memref<98xf32, #tpu.memory_space<smem>>
      %c1_218 = arith.constant 1 : index
      %c2_219 = arith.constant 2 : index
      %c5_220 = arith.constant 5 : index
      %432 = vector.load %arg5[%c1_218, %c2_219, %c5_220] : memref<2x22x22xf32, #tpu.memory_space<vmem>>, vector<1x16x16xf32>
      %433 = vector.shape_cast %432 : vector<1x16x16xf32> to vector<16x16xf32>
      %434 = vector.broadcast %431 : f32 to vector<16x16xf32>
      %435 = arith.mulf %434, %433 : vector<16x16xf32>
      %436 = arith.addf %430, %435 : vector<16x16xf32>
      %c69 = arith.constant 69 : index
      %437 = memref.load %arg2[%c69] : memref<98xf32, #tpu.memory_space<smem>>
      %c1_221 = arith.constant 1 : index
      %c2_222 = arith.constant 2 : index
      %c6_223 = arith.constant 6 : index
      %438 = vector.load %arg5[%c1_221, %c2_222, %c6_223] : memref<2x22x22xf32, #tpu.memory_space<vmem>>, vector<1x16x16xf32>
      %439 = vector.shape_cast %438 : vector<1x16x16xf32> to vector<16x16xf32>
      %440 = vector.broadcast %437 : f32 to vector<16x16xf32>
      %441 = arith.mulf %440, %439 : vector<16x16xf32>
      %442 = arith.addf %436, %441 : vector<16x16xf32>
      %c70 = arith.constant 70 : index
      %443 = memref.load %arg2[%c70] : memref<98xf32, #tpu.memory_space<smem>>
      %c1_224 = arith.constant 1 : index
      %c3_225 = arith.constant 3 : index
      %c0_226 = arith.constant 0 : index
      %444 = vector.load %arg5[%c1_224, %c3_225, %c0_226] : memref<2x22x22xf32, #tpu.memory_space<vmem>>, vector<1x16x16xf32>
      %445 = vector.shape_cast %444 : vector<1x16x16xf32> to vector<16x16xf32>
      %446 = vector.broadcast %443 : f32 to vector<16x16xf32>
      %447 = arith.mulf %446, %445 : vector<16x16xf32>
      %448 = arith.addf %442, %447 : vector<16x16xf32>
      %c71 = arith.constant 71 : index
      %449 = memref.load %arg2[%c71] : memref<98xf32, #tpu.memory_space<smem>>
      %c1_227 = arith.constant 1 : index
      %c3_228 = arith.constant 3 : index
      %c1_229 = arith.constant 1 : index
      %450 = vector.load %arg5[%c1_227, %c3_228, %c1_229] : memref<2x22x22xf32, #tpu.memory_space<vmem>>, vector<1x16x16xf32>
      %451 = vector.shape_cast %450 : vector<1x16x16xf32> to vector<16x16xf32>
      %452 = vector.broadcast %449 : f32 to vector<16x16xf32>
      %453 = arith.mulf %452, %451 : vector<16x16xf32>
      %454 = arith.addf %448, %453 : vector<16x16xf32>
      %c72 = arith.constant 72 : index
      %455 = memref.load %arg2[%c72] : memref<98xf32, #tpu.memory_space<smem>>
      %c1_230 = arith.constant 1 : index
      %c3_231 = arith.constant 3 : index
      %c2_232 = arith.constant 2 : index
      %456 = vector.load %arg5[%c1_230, %c3_231, %c2_232] : memref<2x22x22xf32, #tpu.memory_space<vmem>>, vector<1x16x16xf32>
      %457 = vector.shape_cast %456 : vector<1x16x16xf32> to vector<16x16xf32>
      %458 = vector.broadcast %455 : f32 to vector<16x16xf32>
      %459 = arith.mulf %458, %457 : vector<16x16xf32>
      %460 = arith.addf %454, %459 : vector<16x16xf32>
      %c73 = arith.constant 73 : index
      %461 = memref.load %arg2[%c73] : memref<98xf32, #tpu.memory_space<smem>>
      %c1_233 = arith.constant 1 : index
      %c3_234 = arith.constant 3 : index
      %c3_235 = arith.constant 3 : index
      %462 = vector.load %arg5[%c1_233, %c3_234, %c3_235] : memref<2x22x22xf32, #tpu.memory_space<vmem>>, vector<1x16x16xf32>
      %463 = vector.shape_cast %462 : vector<1x16x16xf32> to vector<16x16xf32>
      %464 = vector.broadcast %461 : f32 to vector<16x16xf32>
      %465 = arith.mulf %464, %463 : vector<16x16xf32>
      %466 = arith.addf %460, %465 : vector<16x16xf32>
      %c74 = arith.constant 74 : index
      %467 = memref.load %arg2[%c74] : memref<98xf32, #tpu.memory_space<smem>>
      %c1_236 = arith.constant 1 : index
      %c3_237 = arith.constant 3 : index
      %c4_238 = arith.constant 4 : index
      %468 = vector.load %arg5[%c1_236, %c3_237, %c4_238] : memref<2x22x22xf32, #tpu.memory_space<vmem>>, vector<1x16x16xf32>
      %469 = vector.shape_cast %468 : vector<1x16x16xf32> to vector<16x16xf32>
      %470 = vector.broadcast %467 : f32 to vector<16x16xf32>
      %471 = arith.mulf %470, %469 : vector<16x16xf32>
      %472 = arith.addf %466, %471 : vector<16x16xf32>
      %c75 = arith.constant 75 : index
      %473 = memref.load %arg2[%c75] : memref<98xf32, #tpu.memory_space<smem>>
      %c1_239 = arith.constant 1 : index
      %c3_240 = arith.constant 3 : index
      %c5_241 = arith.constant 5 : index
      %474 = vector.load %arg5[%c1_239, %c3_240, %c5_241] : memref<2x22x22xf32, #tpu.memory_space<vmem>>, vector<1x16x16xf32>
      %475 = vector.shape_cast %474 : vector<1x16x16xf32> to vector<16x16xf32>
      %476 = vector.broadcast %473 : f32 to vector<16x16xf32>
      %477 = arith.mulf %476, %475 : vector<16x16xf32>
      %478 = arith.addf %472, %477 : vector<16x16xf32>
      %c76 = arith.constant 76 : index
      %479 = memref.load %arg2[%c76] : memref<98xf32, #tpu.memory_space<smem>>
      %c1_242 = arith.constant 1 : index
      %c3_243 = arith.constant 3 : index
      %c6_244 = arith.constant 6 : index
      %480 = vector.load %arg5[%c1_242, %c3_243, %c6_244] : memref<2x22x22xf32, #tpu.memory_space<vmem>>, vector<1x16x16xf32>
      %481 = vector.shape_cast %480 : vector<1x16x16xf32> to vector<16x16xf32>
      %482 = vector.broadcast %479 : f32 to vector<16x16xf32>
      %483 = arith.mulf %482, %481 : vector<16x16xf32>
      %484 = arith.addf %478, %483 : vector<16x16xf32>
      %c77 = arith.constant 77 : index
      %485 = memref.load %arg2[%c77] : memref<98xf32, #tpu.memory_space<smem>>
      %c1_245 = arith.constant 1 : index
      %c4_246 = arith.constant 4 : index
      %c0_247 = arith.constant 0 : index
      %486 = vector.load %arg5[%c1_245, %c4_246, %c0_247] : memref<2x22x22xf32, #tpu.memory_space<vmem>>, vector<1x16x16xf32>
      %487 = vector.shape_cast %486 : vector<1x16x16xf32> to vector<16x16xf32>
      %488 = vector.broadcast %485 : f32 to vector<16x16xf32>
      %489 = arith.mulf %488, %487 : vector<16x16xf32>
      %490 = arith.addf %484, %489 : vector<16x16xf32>
      %c78 = arith.constant 78 : index
      %491 = memref.load %arg2[%c78] : memref<98xf32, #tpu.memory_space<smem>>
      %c1_248 = arith.constant 1 : index
      %c4_249 = arith.constant 4 : index
      %c1_250 = arith.constant 1 : index
      %492 = vector.load %arg5[%c1_248, %c4_249, %c1_250] : memref<2x22x22xf32, #tpu.memory_space<vmem>>, vector<1x16x16xf32>
      %493 = vector.shape_cast %492 : vector<1x16x16xf32> to vector<16x16xf32>
      %494 = vector.broadcast %491 : f32 to vector<16x16xf32>
      %495 = arith.mulf %494, %493 : vector<16x16xf32>
      %496 = arith.addf %490, %495 : vector<16x16xf32>
      %c79 = arith.constant 79 : index
      %497 = memref.load %arg2[%c79] : memref<98xf32, #tpu.memory_space<smem>>
      %c1_251 = arith.constant 1 : index
      %c4_252 = arith.constant 4 : index
      %c2_253 = arith.constant 2 : index
      %498 = vector.load %arg5[%c1_251, %c4_252, %c2_253] : memref<2x22x22xf32, #tpu.memory_space<vmem>>, vector<1x16x16xf32>
      %499 = vector.shape_cast %498 : vector<1x16x16xf32> to vector<16x16xf32>
      %500 = vector.broadcast %497 : f32 to vector<16x16xf32>
      %501 = arith.mulf %500, %499 : vector<16x16xf32>
      %502 = arith.addf %496, %501 : vector<16x16xf32>
      %c80 = arith.constant 80 : index
      %503 = memref.load %arg2[%c80] : memref<98xf32, #tpu.memory_space<smem>>
      %c1_254 = arith.constant 1 : index
      %c4_255 = arith.constant 4 : index
      %c3_256 = arith.constant 3 : index
      %504 = vector.load %arg5[%c1_254, %c4_255, %c3_256] : memref<2x22x22xf32, #tpu.memory_space<vmem>>, vector<1x16x16xf32>
      %505 = vector.shape_cast %504 : vector<1x16x16xf32> to vector<16x16xf32>
      %506 = vector.broadcast %503 : f32 to vector<16x16xf32>
      %507 = arith.mulf %506, %505 : vector<16x16xf32>
      %508 = arith.addf %502, %507 : vector<16x16xf32>
      %c81 = arith.constant 81 : index
      %509 = memref.load %arg2[%c81] : memref<98xf32, #tpu.memory_space<smem>>
      %c1_257 = arith.constant 1 : index
      %c4_258 = arith.constant 4 : index
      %c4_259 = arith.constant 4 : index
      %510 = vector.load %arg5[%c1_257, %c4_258, %c4_259] : memref<2x22x22xf32, #tpu.memory_space<vmem>>, vector<1x16x16xf32>
      %511 = vector.shape_cast %510 : vector<1x16x16xf32> to vector<16x16xf32>
      %512 = vector.broadcast %509 : f32 to vector<16x16xf32>
      %513 = arith.mulf %512, %511 : vector<16x16xf32>
      %514 = arith.addf %508, %513 : vector<16x16xf32>
      %c82 = arith.constant 82 : index
      %515 = memref.load %arg2[%c82] : memref<98xf32, #tpu.memory_space<smem>>
      %c1_260 = arith.constant 1 : index
      %c4_261 = arith.constant 4 : index
      %c5_262 = arith.constant 5 : index
      %516 = vector.load %arg5[%c1_260, %c4_261, %c5_262] : memref<2x22x22xf32, #tpu.memory_space<vmem>>, vector<1x16x16xf32>
      %517 = vector.shape_cast %516 : vector<1x16x16xf32> to vector<16x16xf32>
      %518 = vector.broadcast %515 : f32 to vector<16x16xf32>
      %519 = arith.mulf %518, %517 : vector<16x16xf32>
      %520 = arith.addf %514, %519 : vector<16x16xf32>
      %c83 = arith.constant 83 : index
      %521 = memref.load %arg2[%c83] : memref<98xf32, #tpu.memory_space<smem>>
      %c1_263 = arith.constant 1 : index
      %c4_264 = arith.constant 4 : index
      %c6_265 = arith.constant 6 : index
      %522 = vector.load %arg5[%c1_263, %c4_264, %c6_265] : memref<2x22x22xf32, #tpu.memory_space<vmem>>, vector<1x16x16xf32>
      %523 = vector.shape_cast %522 : vector<1x16x16xf32> to vector<16x16xf32>
      %524 = vector.broadcast %521 : f32 to vector<16x16xf32>
      %525 = arith.mulf %524, %523 : vector<16x16xf32>
      %526 = arith.addf %520, %525 : vector<16x16xf32>
      %c84 = arith.constant 84 : index
      %527 = memref.load %arg2[%c84] : memref<98xf32, #tpu.memory_space<smem>>
      %c1_266 = arith.constant 1 : index
      %c5_267 = arith.constant 5 : index
      %c0_268 = arith.constant 0 : index
      %528 = vector.load %arg5[%c1_266, %c5_267, %c0_268] : memref<2x22x22xf32, #tpu.memory_space<vmem>>, vector<1x16x16xf32>
      %529 = vector.shape_cast %528 : vector<1x16x16xf32> to vector<16x16xf32>
      %530 = vector.broadcast %527 : f32 to vector<16x16xf32>
      %531 = arith.mulf %530, %529 : vector<16x16xf32>
      %532 = arith.addf %526, %531 : vector<16x16xf32>
      %c85 = arith.constant 85 : index
      %533 = memref.load %arg2[%c85] : memref<98xf32, #tpu.memory_space<smem>>
      %c1_269 = arith.constant 1 : index
      %c5_270 = arith.constant 5 : index
      %c1_271 = arith.constant 1 : index
      %534 = vector.load %arg5[%c1_269, %c5_270, %c1_271] : memref<2x22x22xf32, #tpu.memory_space<vmem>>, vector<1x16x16xf32>
      %535 = vector.shape_cast %534 : vector<1x16x16xf32> to vector<16x16xf32>
      %536 = vector.broadcast %533 : f32 to vector<16x16xf32>
      %537 = arith.mulf %536, %535 : vector<16x16xf32>
      %538 = arith.addf %532, %537 : vector<16x16xf32>
      %c86 = arith.constant 86 : index
      %539 = memref.load %arg2[%c86] : memref<98xf32, #tpu.memory_space<smem>>
      %c1_272 = arith.constant 1 : index
      %c5_273 = arith.constant 5 : index
      %c2_274 = arith.constant 2 : index
      %540 = vector.load %arg5[%c1_272, %c5_273, %c2_274] : memref<2x22x22xf32, #tpu.memory_space<vmem>>, vector<1x16x16xf32>
      %541 = vector.shape_cast %540 : vector<1x16x16xf32> to vector<16x16xf32>
      %542 = vector.broadcast %539 : f32 to vector<16x16xf32>
      %543 = arith.mulf %542, %541 : vector<16x16xf32>
      %544 = arith.addf %538, %543 : vector<16x16xf32>
      %c87 = arith.constant 87 : index
      %545 = memref.load %arg2[%c87] : memref<98xf32, #tpu.memory_space<smem>>
      %c1_275 = arith.constant 1 : index
      %c5_276 = arith.constant 5 : index
      %c3_277 = arith.constant 3 : index
      %546 = vector.load %arg5[%c1_275, %c5_276, %c3_277] : memref<2x22x22xf32, #tpu.memory_space<vmem>>, vector<1x16x16xf32>
      %547 = vector.shape_cast %546 : vector<1x16x16xf32> to vector<16x16xf32>
      %548 = vector.broadcast %545 : f32 to vector<16x16xf32>
      %549 = arith.mulf %548, %547 : vector<16x16xf32>
      %550 = arith.addf %544, %549 : vector<16x16xf32>
      %c88 = arith.constant 88 : index
      %551 = memref.load %arg2[%c88] : memref<98xf32, #tpu.memory_space<smem>>
      %c1_278 = arith.constant 1 : index
      %c5_279 = arith.constant 5 : index
      %c4_280 = arith.constant 4 : index
      %552 = vector.load %arg5[%c1_278, %c5_279, %c4_280] : memref<2x22x22xf32, #tpu.memory_space<vmem>>, vector<1x16x16xf32>
      %553 = vector.shape_cast %552 : vector<1x16x16xf32> to vector<16x16xf32>
      %554 = vector.broadcast %551 : f32 to vector<16x16xf32>
      %555 = arith.mulf %554, %553 : vector<16x16xf32>
      %556 = arith.addf %550, %555 : vector<16x16xf32>
      %c89 = arith.constant 89 : index
      %557 = memref.load %arg2[%c89] : memref<98xf32, #tpu.memory_space<smem>>
      %c1_281 = arith.constant 1 : index
      %c5_282 = arith.constant 5 : index
      %c5_283 = arith.constant 5 : index
      %558 = vector.load %arg5[%c1_281, %c5_282, %c5_283] : memref<2x22x22xf32, #tpu.memory_space<vmem>>, vector<1x16x16xf32>
      %559 = vector.shape_cast %558 : vector<1x16x16xf32> to vector<16x16xf32>
      %560 = vector.broadcast %557 : f32 to vector<16x16xf32>
      %561 = arith.mulf %560, %559 : vector<16x16xf32>
      %562 = arith.addf %556, %561 : vector<16x16xf32>
      %c90 = arith.constant 90 : index
      %563 = memref.load %arg2[%c90] : memref<98xf32, #tpu.memory_space<smem>>
      %c1_284 = arith.constant 1 : index
      %c5_285 = arith.constant 5 : index
      %c6_286 = arith.constant 6 : index
      %564 = vector.load %arg5[%c1_284, %c5_285, %c6_286] : memref<2x22x22xf32, #tpu.memory_space<vmem>>, vector<1x16x16xf32>
      %565 = vector.shape_cast %564 : vector<1x16x16xf32> to vector<16x16xf32>
      %566 = vector.broadcast %563 : f32 to vector<16x16xf32>
      %567 = arith.mulf %566, %565 : vector<16x16xf32>
      %568 = arith.addf %562, %567 : vector<16x16xf32>
      %c91 = arith.constant 91 : index
      %569 = memref.load %arg2[%c91] : memref<98xf32, #tpu.memory_space<smem>>
      %c1_287 = arith.constant 1 : index
      %c6_288 = arith.constant 6 : index
      %c0_289 = arith.constant 0 : index
      %570 = vector.load %arg5[%c1_287, %c6_288, %c0_289] : memref<2x22x22xf32, #tpu.memory_space<vmem>>, vector<1x16x16xf32>
      %571 = vector.shape_cast %570 : vector<1x16x16xf32> to vector<16x16xf32>
      %572 = vector.broadcast %569 : f32 to vector<16x16xf32>
      %573 = arith.mulf %572, %571 : vector<16x16xf32>
      %574 = arith.addf %568, %573 : vector<16x16xf32>
      %c92 = arith.constant 92 : index
      %575 = memref.load %arg2[%c92] : memref<98xf32, #tpu.memory_space<smem>>
      %c1_290 = arith.constant 1 : index
      %c6_291 = arith.constant 6 : index
      %c1_292 = arith.constant 1 : index
      %576 = vector.load %arg5[%c1_290, %c6_291, %c1_292] : memref<2x22x22xf32, #tpu.memory_space<vmem>>, vector<1x16x16xf32>
      %577 = vector.shape_cast %576 : vector<1x16x16xf32> to vector<16x16xf32>
      %578 = vector.broadcast %575 : f32 to vector<16x16xf32>
      %579 = arith.mulf %578, %577 : vector<16x16xf32>
      %580 = arith.addf %574, %579 : vector<16x16xf32>
      %c93 = arith.constant 93 : index
      %581 = memref.load %arg2[%c93] : memref<98xf32, #tpu.memory_space<smem>>
      %c1_293 = arith.constant 1 : index
      %c6_294 = arith.constant 6 : index
      %c2_295 = arith.constant 2 : index
      %582 = vector.load %arg5[%c1_293, %c6_294, %c2_295] : memref<2x22x22xf32, #tpu.memory_space<vmem>>, vector<1x16x16xf32>
      %583 = vector.shape_cast %582 : vector<1x16x16xf32> to vector<16x16xf32>
      %584 = vector.broadcast %581 : f32 to vector<16x16xf32>
      %585 = arith.mulf %584, %583 : vector<16x16xf32>
      %586 = arith.addf %580, %585 : vector<16x16xf32>
      %c94 = arith.constant 94 : index
      %587 = memref.load %arg2[%c94] : memref<98xf32, #tpu.memory_space<smem>>
      %c1_296 = arith.constant 1 : index
      %c6_297 = arith.constant 6 : index
      %c3_298 = arith.constant 3 : index
      %588 = vector.load %arg5[%c1_296, %c6_297, %c3_298] : memref<2x22x22xf32, #tpu.memory_space<vmem>>, vector<1x16x16xf32>
      %589 = vector.shape_cast %588 : vector<1x16x16xf32> to vector<16x16xf32>
      %590 = vector.broadcast %587 : f32 to vector<16x16xf32>
      %591 = arith.mulf %590, %589 : vector<16x16xf32>
      %592 = arith.addf %586, %591 : vector<16x16xf32>
      %c95 = arith.constant 95 : index
      %593 = memref.load %arg2[%c95] : memref<98xf32, #tpu.memory_space<smem>>
      %c1_299 = arith.constant 1 : index
      %c6_300 = arith.constant 6 : index
      %c4_301 = arith.constant 4 : index
      %594 = vector.load %arg5[%c1_299, %c6_300, %c4_301] : memref<2x22x22xf32, #tpu.memory_space<vmem>>, vector<1x16x16xf32>
      %595 = vector.shape_cast %594 : vector<1x16x16xf32> to vector<16x16xf32>
      %596 = vector.broadcast %593 : f32 to vector<16x16xf32>
      %597 = arith.mulf %596, %595 : vector<16x16xf32>
      %598 = arith.addf %592, %597 : vector<16x16xf32>
      %c96 = arith.constant 96 : index
      %599 = memref.load %arg2[%c96] : memref<98xf32, #tpu.memory_space<smem>>
      %c1_302 = arith.constant 1 : index
      %c6_303 = arith.constant 6 : index
      %c5_304 = arith.constant 5 : index
      %600 = vector.load %arg5[%c1_302, %c6_303, %c5_304] : memref<2x22x22xf32, #tpu.memory_space<vmem>>, vector<1x16x16xf32>
      %601 = vector.shape_cast %600 : vector<1x16x16xf32> to vector<16x16xf32>
      %602 = vector.broadcast %599 : f32 to vector<16x16xf32>
      %603 = arith.mulf %602, %601 : vector<16x16xf32>
      %604 = arith.addf %598, %603 : vector<16x16xf32>
      %c97 = arith.constant 97 : index
      %605 = memref.load %arg2[%c97] : memref<98xf32, #tpu.memory_space<smem>>
      %c1_305 = arith.constant 1 : index
      %c6_306 = arith.constant 6 : index
      %c6_307 = arith.constant 6 : index
      %606 = vector.load %arg5[%c1_305, %c6_306, %c6_307] : memref<2x22x22xf32, #tpu.memory_space<vmem>>, vector<1x16x16xf32>
      %607 = vector.shape_cast %606 : vector<1x16x16xf32> to vector<16x16xf32>
      %608 = vector.broadcast %605 : f32 to vector<16x16xf32>
      %609 = arith.mulf %608, %607 : vector<16x16xf32>
      %610 = arith.addf %604, %609 : vector<16x16xf32>
      %611 = arith.negf %610 : vector<16x16xf32>
      %612 = math.exp %611 : vector<16x16xf32>
      %cst_308 = arith.constant 1.000000e+00 : f32
      %613 = vector.broadcast %cst_308 : f32 to vector<16x16xf32>
      %614 = arith.addf %613, %612 : vector<16x16xf32>
      %615 = arith.divf %613, %614 : vector<16x16xf32>
      %c0_309 = arith.constant 0 : index
      %c0_310 = arith.constant 0 : index
      %c0_311 = arith.constant 0 : index
      %c0_312 = arith.constant 0 : index
      %616 = vector.load %arg4[%c0_309, %c0_310, %c0_311, %c0_312] : memref<1x1x16x16xf32, #tpu.memory_space<vmem>>, vector<1x1x16x16xf32>
      %617 = vector.shape_cast %616 : vector<1x1x16x16xf32> to vector<16x16xf32>
      %618 = vector.shape_cast %615 : vector<16x16xf32> to vector<1x1x16x16xf32>
      tpu.vector_store %arg4[%c0_309, %c0_310, %c0_311, %c0_312], %618 {strides = array<i32>} : memref<1x1x16x16xf32, #tpu.memory_space<vmem>>, vector<1x1x16x16xf32>,
    } else {
    }
    return
  }
  func.func @transform_0(%arg0: i32, %arg1: i32) -> i32 {
    %c0_i32 = arith.constant 0 : i32
    %c0_i32_0 = arith.constant 0 : i32
    return %c0_i32 : i32
  }
  func.func @transform_1(%arg0: i32, %arg1: i32) -> (i32, i32, i32, i32) {
    %c0_i32 = arith.constant 0 : i32
    %c0_i32_0 = arith.constant 0 : i32
    %c0_i32_1 = arith.constant 0 : i32
    return %arg0, %c0_i32, %arg1, %c0_i32_0 : i32, i32, i32, i32
  }
  func.func @transform_2(%arg0: i32, %arg1: i32) -> (i32, i32, i32, i32) {
    %c0_i32 = arith.constant 0 : i32
    %c0_i32_0 = arith.constant 0 : i32
    %c0_i32_1 = arith.constant 0 : i32
    %c0_i32_2 = arith.constant 0 : i32
    return %arg0, %c0_i32, %c0_i32_0, %c0_i32_1 : i32, i32, i32, i32
  }
}

</mosaic_0001>

<bundles_post_ra>
// kernel: tpu_custom_call.1
= control target key start
LH: loop header
LB: loop body
LE: loop exit
PB: predicated region body
PF: predicated region fallthrough
CT: control target
= control target key end

     0   :  { %7 = vsyncpa [#allocation6], 0  ;;  %s2918_s0 = inlined_call_operand.hbm [shape: f32[98], index: 0, kind: input, shape index: {}]   ;;  %s2919_s1 = inlined_call_operand.hbm [shape: f32[2,4,16,16], index: 1, kind: input, shape index: {}]   ;;  %s2920_s2 = inlined_call_operand.hbm [shape: f32[2,1,16,16], index: 2, kind: output, shape index: {}]  }
   0x1   :  { %8 = vsyncpa [#allocation4], 0 }
   0x2   :  { %10 = vsyncpa [#allocation4 + $0x1], 0 }
   0x3   :  { %11 = vsyncpa [#allocation5], 0 }
   0x4   :  { %13 = vsyncpa [#allocation5 + $0x1], 0  ;;  %s2106_s9 = smov 0   ;;  %s2108_s10 = smov 0  }
   0x5   :  { %s2110_s11 = smov 0   ;;  %s2112_s12 = smov 0  }
   0x6   :  { %s2114_s13 = smov 0   ;;  %s2116_s14 = smov 0  }
   0x7 LB: > { %s1730_s15 = sadd.s32 4294967295, %s2076_s14   ;;  %s1731_s16 = sadd.s32 4294967294, %s2076_s14   ;;  %s2076_s14 = sphi %s2116_s14, %s19_s14   ;;  %s2072_s13 = sphi %s2114_s13, %s2932_s13   ;;  %s2068_s12 = sphi %s2112_s12, %s2931_s12   ;;  %s2064_s11 = sphi %s2110_s11, %s2930_s11   ;;  %s2060_s10 = sphi %s2108_s10, %s2929_s10   ;;  %s2056_s9 = sphi %s2106_s9, %s2928_s9  }
   0x8   : > { %s61_s17 = sadd.s32 1, %s2064_s11  ;;  %p68_p0 = scmp.ne.s32.totalorder %s2064_s11, %s2060_s10 }
   0x9   : > { %p69_p1 = scmp.eq.s32.totalorder %s2076_s14, 0  ;;  %p74_p2 = scmp.ne.s32.totalorder %s2060_s10, %s2056_s9 }
   0xa   : > { %p2144_p3 = scmp.eq.s32.totalorder %s1730_s15, 0  ;;  %p98_p4 = scmp.eq.s32.totalorder %s1730_s15, 1 }
   0xb   : > { %p2148_p5 = por %p69_p1, %p68_p0  ;;  %p104_p6 = scmp.eq.s32.totalorder %s1731_s16, 1 }
   0xc   : > { %p2154_p7 = por %p2144_p3, %p74_p2  ;;  %p2158_p8 = por %p98_p4, %p68_p0 }
   0xd   : > { %p2162_p9 = por %p104_p6, %p74_p2  ;;  %p1732_p10 = scmp.ge.s32.totalorder %s2076_s14, 1 }
   0xe   : > { %p111_p11 = scmp.lt.s32.totalorder %s2076_s14, 3  ;;  %s123_s25 = sshll.u32 %s2918_s0, 4  ;;  %s124_s25 = int_to_ptr.hbm [resolvable:$true] %s123_s25 }
   0xf   : > { %p1734_p13 = scmp.ge.s32.totalorder %s2076_s14, 2  ;;  %p1873_p0 = scmp.lt.s32.totalorder %s2076_s14, 2 }
  0x10   : > { %p2171_p12 = pnand %p1732_p10, %p111_p11  ;;  %s31_s28 = sadd.s32 1, %s2072_s13 }
  0x11   : > { %p2181_p2 = pnand %p1873_p0, %p2148_p5  ;;  %p33_p6 = scmp.ge.s32.totalorder %s31_s28, 2 }
  0x12   : > { %p1860_p1 = pneg %p2171_p12  ;;  %s134_s29 = sand.u32 1, %s2064_s11  }
  0x13   : > { %s2078_s30 = smov [#allocation3]   ;;  %s2934_s28 = smov (%p33_p6, %s31_s28), 0 }
  0x14   : > { %p1861_p4 = pnand %p1860_p1, %p2144_p3  ;;  %s1735_s3 = sshll.u32 %s134_s29, 6 }
  0x15   : > { %s56_s4 = ssub.s32 %s2072_s13, %s2934_s28  ;;  %s1850_s5 = sshll.u32 %s2072_s13, 6 }
  0x16   : > { %1863 = dma.hbm_to_smem (!%p1861_p4), %s124_s25, 16, %s2078_s30, [#allocation6]  }
  0x17   : > { %p59_p10 = scmp.eq.s32.totalorder %s56_s4, 0  ;;  %s145_s8 = scalar_lea.hbm %s2919_s1, %s1850_s5 }
  0x18   : > { %s138_s15 = scalar_lea.vmem [#allocation7], %s1735_s3  ;;  %s146_s23 = sshll.u32 %s145_s8, 4  ;;  %s147_s23 = int_to_ptr.hbm [resolvable:$true] %s146_s23 }
  0x19   : > { %s148_s16 = sshll.u32 %s138_s15, 4  ;;  %s135_s24 = scalar_lea.sflag [#allocation4], %s134_s29  ;;  %s149_s16 = int_to_ptr.vmem [resolvable:$true] %s148_s16 }
  0x1a   : > { %s2200_s19 = scalar_select %p59_p10, %s2064_s11, %s61_s17  }
  0x1b   : > { %s2079_s25 = smov 128   ;;  %s2080_s30 = smov 8  }
  0x1c   : > { %1867 = dma.hbm_to_vmem [thread:$0]  (!%p2181_p2), %s147_s23, 1024, %s149_s16, %s135_s24, %s2079_s25, %s2079_s25, %s2080_s30  }
  0x1d   : > { %160 = sbr.rel (%p2171_p12) target bundleno = 767 (0x2ff), region = 28 }
  0x22   : > { %2043 = dma.done.wait (%p2144_p3), [#allocation6], 16  }
  0x23   : > { %2045 = vsyncadd (%p2144_p3), [#allocation6], 4294967280  ;;  %s2211_s17 = sand.u32 1, %s2060_s10  }
  0x24   : > { %s1740_s29 = sshll.u32 %s2211_s17, 6  ;;  %s168_s3 = scalar_lea.sflag [#allocation4], %s2211_s17 }
  0x25   : > { %s171_s4 = scalar_lea.vmem [#allocation7], %s1740_s29 }
  0x26   : > { %2047 = dma.done.wait (%p2154_p7), %s168_s3, 1024  }
  0x27   : > { %2049 = vsyncadd (%p2154_p7), %s168_s3, 4294966272 }
  0x28   : > { %177 = sfence }
  0x29   : > { %v215_v0 = vld [vmem:[%s171_s4] sm:$0xff]  ;;  %v217_v1 = vld [vmem:[%s171_s4 + $0x10] sm:$0xff]  ;;  %vm223_vm0 = vcmask 130048   ;;  %v216_v7 = vld [vmem:[%s171_s4 + $0x8] sm:$0xff]  ;;  %s2081_s18 = smov 3   ;;  %vm202_vm1 = vcmask 23552  }
  0x2a   : > { %v219_v2 = vld [vmem:[%s171_s4 + $0x20] sm:$0xff]  ;;  %v221_v3 = vld [vmem:[%s171_s4 + $0x30] sm:$0xff]  ;;  %v224_v4 = vsel %vm223_vm0, %v215_v0, 0.0  ;;  %v225_v5 = vsel %vm223_vm0, %v217_v1, 0.0  ;;  %v218_v8 = vld [vmem:[%s171_s4 + $0x18] sm:$0xff]  ;;  %v231_v11 = vsel %vm223_vm0, %v216_v7, 0.0 }
  0x2b   : > { %v227_v6 = vsel %vm223_vm0, %v219_v2, 0.0  ;;  %v226_v9 = vadd.f32 %v225_v5, %v224_v4  ;;  %v220_v10 = vld [vmem:[%s171_s4 + $0x28] sm:$0xff]  ;;  %v232_v12 = vsel %vm223_vm0, %v218_v8, 0.0  ;;  %v229_v13 = vsel %vm223_vm0, %v221_v3, 0.0  ;;  %v222_v18 = vld [vmem:[%s171_s4 + $0x38] sm:$0xff]  ;;  %s1747_s20 = sld [smem:[#allocation3 + $0x2]] }
  0x2c   : > { %v233_v14 = vadd.f32 %v232_v12, %v231_v11  ;;  %v234_v15 = vsel %vm223_vm0, %v220_v10, 0.0  ;;  %v238_v16 = vsel %vm223_vm0, %v215_v0, -inf  ;;  %v239_v19 = vsel %vm223_vm0, %v217_v1, -inf  ;;  %s1746_s26 = sld [smem:[#allocation3 + $0x1]]  ;;  %s2083_s5 = smov 126  }
  0x2d   : > { %v228_v17 = vadd.f32 %v227_v6, %v226_v9  ;;  %v240_v20 = vsel %vm223_vm0, %v219_v2, -inf  ;;  %v242_v21 = vsel %vm223_vm0, %v221_v3, -inf  ;;  %v236_v26 = vsel %vm223_vm0, %v222_v18, 0.0  ;;  %s1748_s27 = sld [smem:[#allocation3 + $0x3]]  ;;  %s2084_s6 = smov 127  }
  0x2e   : > { %v241_v22 = vmax.f32 %v238_v16, %v240_v20  ;;  %v243_v23 = vmax.f32 %v239_v19, %v242_v21  ;;  %v235_v25 = vadd.f32 %v234_v15, %v233_v14  ;;  %v2082_v31 = vmov 0.0   ;;  %s1749_s7 = sld [smem:[#allocation3 + $0x4]]  ;;  %s2085_s15 = smov 125  }
  0x2f   : > { %v230_v24 = vadd.f32 %v229_v13, %v228_v17  ;;  %203 = vst.msk [vmem:[#allocation2 + $0x3] sm:$0xff] %vm202_vm1, %v2082_v31  ;;  %vm205_vm2 = vcmask 179352   ;;  %v245_v32 = vsel %vm223_vm0, %v216_v7, -inf  ;;  %v246_v33 = vsel %vm223_vm0, %v218_v8, -inf  ;;  %s1750_s8 = sld [smem:[#allocation3 + $0x5]]  ;;  %s2086_s23 = smov 124  }
  0x30   : > { %v244_v27 = vmax.f32 %v241_v22, %v243_v23  ;;  %v237_v29 = vadd.f32 %v236_v26, %v235_v25  ;;  %v247_v34 = vsel %vm223_vm0, %v220_v10, -inf  ;;  %vm199_vm3 = vcmask 174080   ;;  %206 = vst.msk [vmem:[#allocation2 + $0x3] sm:$0xff] %vm205_vm2, %v2082_v31  ;;  %s1751_s16 = sld [smem:[#allocation3 + $0x6]]  ;;  %s2087_s24 = smov 123  }
  0x31   : > { %v252_v28 = vmul.f32 0.25, %v230_v24  ;;  %v248_v35 = vmax.f32 %v245_v32, %v247_v34  ;;  %v249_v36 = vsel %vm223_vm0, %v222_v18, -inf  ;;  %200 = vst.msk [vmem:[#allocation2] sm:$0x7] %vm199_vm3, %v2082_v31  ;;  %vm265_vm4 = vcmask 154648   ;;  %s1753_s25 = sld [smem:[#allocation3 + $0x8]] }
  0x32   : > { %270 = vrot.lane.b32.xlu1 %v244_v27, %s2081_s18  ;;  %v253_v30 = vmul.f32 0.25, %v237_v29  ;;  %v250_v37 = vmax.f32 %v246_v33, %v249_v36  ;;  %201 = vst.msk [vmem:[#allocation2 + $0x13] sm:$0x7] %vm199_vm3, %v2082_v31  ;;  %v306_v40 = vstv %s1747_s20  ;;  %v292_v41 = vstv %s1746_s26  ;;  %s1754_s30 = sld [smem:[#allocation3 + $0x9]]  ;;  %s2088_s29 = smov 122  }
  0x33   : > { %258 = vrot.lane.b32.xlu0 %v252_v28, %s2081_s18  ;;  %204 = vst.msk [vmem:[#allocation2 + $0xb] sm:$0xff] %vm202_vm1, %v2082_v31  ;;  %v320_v48 = vstv %s1748_s27  ;;  %s1755_s3 = sld [smem:[#allocation3 + $0xa]] }
  0x34   : > { %v251_v38 = vmax.f32 %v248_v35, %v250_v37  ;;  %209 = vst.msk [vmem:[#allocation2 + $0x18] sm:$0x7] %vm199_vm3, %v2082_v31  ;;  %v334_v51 = vstv %s1749_s7  ;;  %s1756_s4 = sld [smem:[#allocation3 + $0xb]] }
  0x35   : > { %210 = vst.msk [vmem:[#allocation2 + $0x2b] sm:$0x7] %vm199_vm3, %v2082_v31  ;;  %v348_v52 = vstv %s1750_s8  ;;  %s1758_s20 = sld [smem:[#allocation3 + $0xd]] }
  0x36   : > { %211 = vst.msk [vmem:[#allocation2 + $0x1b] sm:$0xff] %vm202_vm1, %v2082_v31  ;;  %v362_v56 = vstv %s1751_s16  ;;  %s1760_s26 = sld [smem:[#allocation3 + $0xf]] }
  0x37   : > { %212 = vst.msk [vmem:[#allocation2 + $0x23] sm:$0xff] %vm202_vm1, %v2082_v31  ;;  %v384_v61 = vstv %s1753_s25  ;;  %s1761_s27 = sld [smem:[#allocation3 + $0x10]] }
  0x38   : > { %207 = vst.msk [vmem:[#allocation2 + $0xb] sm:$0xff] %vm205_vm2, %v2082_v31  ;;  %v398_v62 = vstv %s1754_s30  ;;  %s1762_s7 = sld [smem:[#allocation3 + $0x11]] }
  0x39   : > { %213 = vst.msk [vmem:[#allocation2 + $0x1b] sm:$0xff] %vm205_vm2, %v2082_v31  ;;  %v412_v3 = vstv %s1755_s3  ;;  %s1763_s8 = sld [smem:[#allocation3 + $0x12]] }
  0x3a   : > { %272 = vrot.lane.b32.xlu1 %v251_v38, %s2081_s18  ;;  %214 = vst.msk [vmem:[#allocation2 + $0x23] sm:$0xff] %vm205_vm2, %v2082_v31  ;;  %v426_v7 = vstv %s1756_s4  ;;  %s1764_s16 = sld [smem:[#allocation3 + $0x13]] }
  0x3b   : > { %260 = vrot.lane.b32.xlu0 %v253_v30, %s2081_s18  ;;  %s1757_s18 = sld [smem:[#allocation3 + $0xc]]  ;;  %v454_v12 = vstv %s1758_s20 }
  0x3c   : > { %v476_v17 = vstv %s1760_s26  ;;  %s1765_s25 = sld [smem:[#allocation3 + $0x14]] }
  0x3d   : > { %v490_v18 = vstv %s1761_s27  ;;  %s1767_s30 = sld [smem:[#allocation3 + $0x16]] }
  0x3e   : > { %v504_v24 = vstv %s1762_s7  ;;  %s1768_s3 = sld [smem:[#allocation3 + $0x17]] }
  0x3f   : > { %v518_v28 = vstv %s1763_s8  ;;  %s1769_s4 = sld [smem:[#allocation3 + $0x18]] }
  0x40   : > { %v532_v29 = vstv %s1764_s16  ;;  %s1771_s20 = sld [smem:[#allocation3 + $0x1a]] }
  0x41   : > { %v440_v8 = vstv %s1757_s18  ;;  %s1770_s18 = sld [smem:[#allocation3 + $0x19]] }
  0x42   : > { %v546_v34 = vstv %s1765_s25  ;;  %s2345_s26 = sld [smem:[#allocation3 + $0x1b]] }
  0x43   : > { %s283_s27 = sld [smem:[#allocation3]] }
  0x44   : > { %s2353_s7 = sld [smem:[#allocation3 + $0x1d]] }
  0x45   : > { %s2355_s8 = sld [smem:[#allocation3 + $0x1e]] }
  0x46   : > { %s2369_s16 = sld [smem:[#allocation3 + $0x1f]] }
  0x47   : > { %s2371_s25 = sld [smem:[#allocation3 + $0x7]] }
  0xa4   : > { %v271_v22 = vpop.permute.xlu1 %270 }
  0xa5   : > { %v259_v39 = vpop.permute.xlu0 %258  ;;  %1744 = vst.msk [vmem:[#allocation2 + $0x1b] sm:$0xff] %vm265_vm4, %v271_v22 }
  0xa6   : > { %1742 = vst.msk [vmem:[#allocation2 + $0x3] sm:$0xff] %vm265_vm4, %v259_v39 }
  0xac   : > { %v273_v30 = vpop.permute.xlu1 %272 }
  0xad   : > { %v2244_v42 = vld [vmem:[#allocation2] sm:$0xff]  ;;  %v261_v43 = vpop.permute.xlu0 %260  ;;  %1745 = vst.msk [vmem:[#allocation2 + $0x23] sm:$0xff] %vm265_vm4, %v273_v30 }
  0xae   : > { %1743 = vst.msk [vmem:[#allocation2 + $0xb] sm:$0xff] %vm265_vm4, %v261_v43  ;;  %v307_v44 = vmul.f32 %v306_v40, %v2244_v42  ;;  %v293_v45 = vmul.f32 %v292_v41, %v2244_v42  ;;  %v335_v53 = vmul.f32 %v334_v51, %v2244_v42  ;;  %v349_v54 = vmul.f32 %v348_v52, %v2244_v42  ;;  %v2271_v60 = vld [vmem:[#allocation2 + $0x1] sm:$0xff] }
  0xaf   : > { %v321_v55 = vmul.f32 %v320_v48, %v2244_v42  ;;  %v385_v63 = vmul.f32 %v384_v61, %v2271_v60  ;;  %v399_v0 = vmul.f32 %v398_v62, %v2271_v60  ;;  %v363_v1 = vmul.f32 %v362_v56, %v2244_v42  ;;  %v2299_v16 = vld [vmem:[#allocation2 + $0x2] sm:$0xff] }
  0xb0   : > { %311 = vrot.lane.b32.xlu0 %v307_v44, %s2083_s5  ;;  %297 = vrot.lane.b32.xlu2 %v293_v45, %s2084_s6  ;;  %v427_v9 = vmul.f32 %v426_v7, %v2271_v60  ;;  %v441_v10 = vmul.f32 %v440_v8, %v2271_v60  ;;  %v413_v11 = vmul.f32 %v412_v3, %v2271_v60  ;;  %v2329_v39 = vld [vmem:[#allocation2 + $0x3] sm:$0xff] }
  0xb1   : > { %v477_v19 = vmul.f32 %v476_v17, %v2299_v16  ;;  %v491_v20 = vmul.f32 %v490_v18, %v2299_v16  ;;  %v455_v21 = vmul.f32 %v454_v12, %v2271_v60  ;;  %v519_v31 = vmul.f32 %v518_v28, %v2299_v16 }
  0xb2   : > { %v533_v32 = vmul.f32 %v532_v29, %v2299_v16  ;;  %v505_v33 = vmul.f32 %v504_v24, %v2299_v16  ;;  %v547_v45 = vmul.f32 %v546_v34, %v2299_v16 }
  0xb5   : > { %v2251_v46 = vld [vmem:[#allocation2 + $0x8] sm:$0xff] }
  0xb6   : > { %v294_v47 = vmul.f32 %v292_v41, %v2251_v46  ;;  %v308_v49 = vmul.f32 %v306_v40, %v2251_v46  ;;  %v322_v50 = vmul.f32 %v320_v48, %v2251_v46  ;;  %v350_v57 = vmul.f32 %v348_v52, %v2251_v46  ;;  %v2279_v2 = vld [vmem:[#allocation2 + $0x9] sm:$0xff] }
  0xb7   : > { %v364_v58 = vmul.f32 %v362_v56, %v2251_v46  ;;  %v336_v59 = vmul.f32 %v334_v51, %v2251_v46  ;;  %v400_v4 = vmul.f32 %v398_v62, %v2279_v2  ;;  %v414_v5 = vmul.f32 %v412_v3, %v2279_v2  ;;  %v2308_v23 = vld [vmem:[#allocation2 + $0xa] sm:$0xff] }
  0xb8   : > { %313 = vrot.lane.b32.xlu1 %v308_v49, %s2083_s5  ;;  %327 = vrot.lane.b32.xlu0 %v322_v50, %s2085_s15  ;;  %v386_v6 = vmul.f32 %v384_v61, %v2279_v2  ;;  %v442_v13 = vmul.f32 %v440_v8, %v2279_v2  ;;  %v456_v14 = vmul.f32 %v454_v12, %v2279_v2  ;;  %v568_v40 = vstv %s1767_s30  ;;  %s2380_s30 = sld [smem:[#allocation3 + $0x20]] }
  0xb9   : > { %299 = vrot.lane.b32.xlu2 %v294_v47, %s2084_s6  ;;  %v428_v15 = vmul.f32 %v426_v7, %v2279_v2  ;;  %v492_v25 = vmul.f32 %v490_v18, %v2308_v23  ;;  %v506_v26 = vmul.f32 %v504_v24, %v2308_v23  ;;  %v478_v27 = vmul.f32 %v476_v17, %v2308_v23  ;;  %v2337_v47 = vld [vmem:[#allocation2 + $0xb] sm:$0xff] }
  0xba   : > { %v534_v35 = vmul.f32 %v532_v29, %v2308_v23  ;;  %v548_v36 = vmul.f32 %v546_v34, %v2308_v23  ;;  %v520_v37 = vmul.f32 %v518_v28, %v2308_v23  ;;  %v582_v41 = vstv %s1768_s3  ;;  %v2382_v24 = vld [vmem:[#allocation2 + $0xc] sm:$0xff]  ;;  %s2385_s3 = sld [smem:[#allocation3 + $0x21]] }
  0xbb   : > { %v569_v43 = vmul.f32 %v568_v40, %v2329_v39  ;;  %v583_v44 = vmul.f32 %v582_v41, %v2329_v39  ;;  %v596_v49 = vstv %s1769_s4  ;;  %v584_v50 = vmul.f32 %v582_v41, %v2337_v47  ;;  %s2397_s4 = sld [smem:[#allocation3 + $0x22]] }
  0xbc   : > { %v598_v51 = vmul.f32 %v596_v49, %v2337_v47  ;;  %v570_v52 = vmul.f32 %v568_v40, %v2337_v47  ;;  %v638_v62 = vstv %s2345_s26  ;;  %s2421_s26 = sld [smem:[#allocation3 + $0x26]] }
  0xbd   : > { %v639_v17 = vmul.f32 %v638_v62, %v2329_v39 }
  0xbe   : > { %v702_v41 = vstv %s2380_s30  ;;  %s2460_s30 = sld [smem:[#allocation3 + $0x2c]] }
  0xc0   : > { %339 = vrot.lane.b32.xlu1 %v335_v53, %s2086_s23  ;;  %353 = vrot.lane.b32.xlu0 %v349_v54, %s2087_s24  ;;  %v610_v54 = vstv %s1770_s18  ;;  %s2406_s18 = sld [smem:[#allocation3 + $0x24]] }
  0xc1   : > { %325 = vrot.lane.b32.xlu2 %v321_v55, %s2085_s15  ;;  %v624_v55 = vstv %s1771_s20  ;;  %v611_v56 = vmul.f32 %v610_v54, %v2329_v39  ;;  %v612_v3 = vmul.f32 %v610_v54, %v2337_v47  ;;  %s2409_s20 = sld [smem:[#allocation3 + $0x25]] }
  0xc8   : > { %355 = vrot.lane.b32.xlu1 %v350_v57, %s2087_s24  ;;  %369 = vrot.lane.b32.xlu0 %v364_v58, %s2088_s29  ;;  %v625_v57 = vmul.f32 %v624_v55, %v2329_v39  ;;  %v597_v58 = vmul.f32 %v596_v49, %v2329_v39 }
  0xc9   : > { %341 = vrot.lane.b32.xlu2 %v336_v59, %s2086_s23 }
  0xd0   : > { %389 = vrot.lane.b32.xlu1 %v385_v63, %s2084_s6  ;;  %403 = vrot.lane.b32.xlu0 %v399_v0, %s2083_s5  ;;  %v286_v63 = vstv %s283_s27  ;;  %v626_v0 = vmul.f32 %v624_v55, %v2337_v47  ;;  %s2423_s27 = sld [smem:[#allocation3 + $0xe]] }
  0xd1   : > { %367 = vrot.lane.b32.xlu2 %v363_v1, %s2088_s29  ;;  %v640_v1 = vmul.f32 %v638_v62, %v2337_v47  ;;  %v288_v12 = vmul.f32 %v286_v63, %v2251_v46  ;;  %v2417_v62 = vld [vmem:[#allocation2 + $0x5] sm:$0xff] }
  0xd8   : > { %405 = vrot.lane.b32.xlu1 %v400_v4, %s2083_s5  ;;  %419 = vrot.lane.b32.xlu0 %v414_v5, %s2085_s15  ;;  %v287_v4 = vmul.f32 %v286_v63, %v2244_v42  ;;  %v752_v63 = vstv %s2406_s18  ;;  %s2482_s18 = sld [smem:[#allocation3 + $0x2e]] }
  0xd9   : > { %391 = vrot.lane.b32.xlu2 %v386_v6, %s2084_s6 }
  0xe0   : > { %431 = vrot.lane.b32.xlu1 %v427_v9, %s2086_s23  ;;  %445 = vrot.lane.b32.xlu0 %v441_v10, %s2087_s24  ;;  %v2365_v9 = vld [vmem:[#allocation2 + $0x4] sm:$0xff]  ;;  %v660_v10 = vstv %s2353_s7  ;;  %s2431_s7 = sld [smem:[#allocation3 + $0x27]] }
  0xe1   : > { %417 = vrot.lane.b32.xlu2 %v413_v11, %s2085_s15  ;;  %v674_v11 = vstv %s2355_s8  ;;  %v661_v42 = vmul.f32 %v660_v10, %v2365_v9  ;;  %s2436_s8 = sld [smem:[#allocation3 + $0x28]] }
  0xe2   : > { %v676_v29 = vmul.f32 %v674_v11, %v2382_v24 }
  0xe8   : > { %447 = vrot.lane.b32.xlu1 %v442_v13, %s2087_s24  ;;  %461 = vrot.lane.b32.xlu0 %v456_v14, %s2088_s29  ;;  %v675_v14 = vmul.f32 %v674_v11, %v2365_v9 }
  0xe9   : > { %433 = vrot.lane.b32.xlu2 %v428_v15, %s2086_s23 }
  0xf0   : > { %481 = vrot.lane.b32.xlu1 %v477_v19, %s2084_s6  ;;  %495 = vrot.lane.b32.xlu0 %v491_v20, %s2083_s5 }
  0xf1   : > { %459 = vrot.lane.b32.xlu2 %v455_v21, %s2088_s29 }
  0xf8   : > { %497 = vrot.lane.b32.xlu1 %v492_v25, %s2083_s5  ;;  %511 = vrot.lane.b32.xlu0 %v506_v26, %s2085_s15  ;;  %v688_v25 = vstv %s2369_s16  ;;  %v378_v26 = vstv %s2371_s25  ;;  %s2448_s16 = sld [smem:[#allocation3 + $0x29]] }
  0xf9   : > { %483 = vrot.lane.b32.xlu2 %v478_v27, %s2084_s6  ;;  %v690_v30 = vmul.f32 %v688_v25, %v2382_v24  ;;  %s2457_s25 = sld [smem:[#allocation3 + $0x2b]] }
 0x100   : > { %523 = vrot.lane.b32.xlu1 %v519_v31, %s2086_s23  ;;  %537 = vrot.lane.b32.xlu0 %v533_v32, %s2087_s24  ;;  %v379_v31 = vmul.f32 %v378_v26, %v2271_v60  ;;  %v380_v60 = vmul.f32 %v378_v26, %v2279_v2 }
 0x101   : > { %509 = vrot.lane.b32.xlu2 %v505_v33, %s2085_s15  ;;  %v662_v33 = vmul.f32 %v660_v10, %v2382_v24 }
 0x108   : > { %539 = vrot.lane.b32.xlu1 %v534_v35, %s2087_s24  ;;  %553 = vrot.lane.b32.xlu0 %v548_v36, %s2088_s29 }
 0x109   : > { %525 = vrot.lane.b32.xlu2 %v520_v37, %s2086_s23 }
 0x10a   : > { %v298_v38 = vpop.permute.xlu2 %297 }
 0x10b   : > { %v303_v7 = vadd.f32 %v298_v38, %v287_v4 }
 0x110   : > { %573 = vrot.lane.b32.xlu1 %v569_v43, %s2084_s6  ;;  %587 = vrot.lane.b32.xlu0 %v583_v44, %s2083_s5  ;;  %v716_v43 = vstv %s2385_s3  ;;  %s2472_s3 = sld [smem:[#allocation3 + $0x2d]] }
 0x111   : > { %551 = vrot.lane.b32.xlu2 %v547_v45, %s2088_s29  ;;  %v703_v45 = vmul.f32 %v702_v41, %v2365_v9  ;;  %v718_v54 = vmul.f32 %v716_v43, %v2382_v24 }
 0x113   : > { %v300_v48 = vpop.permute.xlu2 %299 }
 0x114   : > { %v304_v15 = vadd.f32 %v300_v48, %v288_v12  ;;  %v717_v48 = vmul.f32 %v716_v43, %v2365_v9 }
 0x118   : > { %589 = vrot.lane.b32.xlu1 %v584_v50, %s2083_s5  ;;  %603 = vrot.lane.b32.xlu0 %v598_v51, %s2085_s15  ;;  %v689_v50 = vmul.f32 %v688_v25, %v2365_v9 }
 0x119   : > { %575 = vrot.lane.b32.xlu2 %v570_v52, %s2084_s6 }
 0x11b   : > { %v326_v53 = vpop.permute.xlu2 %325 }
 0x120   : > { %615 = vrot.lane.b32.xlu1 %v611_v56, %s2086_s23  ;;  %629 = vrot.lane.b32.xlu0 %v625_v57, %s2087_s24  ;;  %v704_v56 = vmul.f32 %v702_v41, %v2382_v24 }
 0x121   : > { %601 = vrot.lane.b32.xlu2 %v597_v58, %s2085_s15 }
 0x122   : > { %v312_v59 = vpop.permute.xlu0 %311 }
 0x123   : > { %v342_v61 = vpop.permute.xlu2 %341  ;;  %v317_v13 = vadd.f32 %v312_v59, %v303_v7 }
 0x125   : > { %v331_v18 = vadd.f32 %v326_v53, %v317_v13  ;;  %v730_v53 = vstv %s2397_s4  ;;  %s2474_s4 = sld [smem:[#allocation3 + $0x15]] }
 0x126   : > { %v732_v55 = vmul.f32 %v730_v53, %v2382_v24 }
 0x128   : > { %631 = vrot.lane.b32.xlu1 %v626_v0, %s2087_s24  ;;  %645 = vrot.lane.b32.xlu0 %v640_v1, %s2088_s29  ;;  %v766_v0 = vstv %s2409_s20  ;;  %s2487_s20 = sld [smem:[#allocation3 + $0x2f]] }
 0x129   : > { %617 = vrot.lane.b32.xlu2 %v612_v3, %s2086_s23  ;;  %v753_v3 = vmul.f32 %v752_v63, %v2417_v62  ;;  %v767_v4 = vmul.f32 %v766_v0, %v2417_v62 }
 0x12a   : > { %v314_v5 = vpop.permute.xlu1 %313  ;;  %v328_v6 = vpop.permute.xlu0 %327 }
 0x12b   : > { %v368_v8 = vpop.permute.xlu2 %367  ;;  %v318_v19 = vadd.f32 %v314_v5, %v304_v15  ;;  %v470_v15 = vstv %s2423_s27  ;;  %s2508_s27 = sld [smem:[#allocation3 + $0x32]] }
 0x12d   : > { %v332_v27 = vadd.f32 %v328_v6, %v318_v19  ;;  %v731_v6 = vmul.f32 %v730_v53, %v2365_v9 }
 0x12f   : > { %v346_v34 = vadd.f32 %v342_v61, %v332_v27 }
 0x130   : > { %665 = vrot.lane.b32.xlu1 %v661_v42, %s2084_s6  ;;  %679 = vrot.lane.b32.xlu0 %v675_v14, %s2083_s5  ;;  %v2433_v42 = vld [vmem:[#allocation2 + $0xd] sm:$0xff]  ;;  %v780_v14 = vstv %s2421_s26  ;;  %s2499_s26 = sld [smem:[#allocation3 + $0x30]] }
 0x131   : > { %643 = vrot.lane.b32.xlu2 %v639_v17, %s2088_s29  ;;  %v768_v19 = vmul.f32 %v766_v0, %v2433_v42 }
 0x132   : > { %v340_v20 = vpop.permute.xlu1 %339  ;;  %v354_v46 = vpop.permute.xlu0 %353 }
 0x133   : > { %v345_v21 = vadd.f32 %v340_v20, %v331_v18  ;;  %v392_v22 = vpop.permute.xlu2 %391  ;;  %v782_v20 = vmul.f32 %v780_v14, %v2433_v42 }
 0x135   : > { %v359_v28 = vadd.f32 %v354_v46, %v345_v21  ;;  %v471_v46 = vmul.f32 %v470_v15, %v2299_v16  ;;  %v472_v16 = vmul.f32 %v470_v15, %v2308_v23 }
 0x137   : > { %v373_v32 = vadd.f32 %v368_v8, %v359_v28 }
 0x138   : > { %681 = vrot.lane.b32.xlu1 %v676_v29, %s2083_s5  ;;  %695 = vrot.lane.b32.xlu0 %v690_v30, %s2085_s15 }
 0x139   : > { %v381_v35 = vadd.f32 %v379_v31, %v373_v32  ;;  %667 = vrot.lane.b32.xlu2 %v662_v33, %s2084_s6  ;;  %v794_v31 = vstv %s2431_s7  ;;  %v808_v32 = vstv %s2436_s8  ;;  %s2511_s7 = sld [smem:[#allocation3 + $0x33]] }
 0x13a   : > { %v356_v36 = vpop.permute.xlu1 %355  ;;  %v370_v37 = vpop.permute.xlu0 %369  ;;  %s2523_s8 = sld [smem:[#allocation3 + $0x34]] }
 0x13b   : > { %v360_v38 = vadd.f32 %v356_v36, %v346_v34  ;;  %v418_v40 = vpop.permute.xlu2 %417  ;;  %v795_v34 = vmul.f32 %v794_v31, %v2417_v62 }
 0x13d   : > { %v374_v44 = vadd.f32 %v370_v37, %v360_v38  ;;  %v781_v37 = vmul.f32 %v780_v14, %v2417_v62 }
 0x13f   : > { %v382_v49 = vadd.f32 %v380_v60, %v374_v44  ;;  %v822_v60 = vstv %s2448_s16  ;;  %s2525_s16 = sld [smem:[#allocation3 + $0x1c]] }
 0x140   : > { %707 = vrot.lane.b32.xlu1 %v703_v45, %s2086_s23  ;;  %721 = vrot.lane.b32.xlu0 %v717_v48, %s2087_s24  ;;  %v810_v45 = vmul.f32 %v808_v32, %v2433_v42  ;;  %v824_v48 = vmul.f32 %v822_v60, %v2433_v42 }
 0x141   : > { %693 = vrot.lane.b32.xlu2 %v689_v50, %s2085_s15  ;;  %v396_v5 = vadd.f32 %v392_v22, %v382_v49  ;;  %v754_v22 = vmul.f32 %v752_v63, %v2433_v42  ;;  %v796_v50 = vmul.f32 %v794_v31, %v2433_v42  ;;  %v823_v63 = vmul.f32 %v822_v60, %v2417_v62 }
 0x142   : > { %v390_v51 = vpop.permute.xlu1 %389  ;;  %v404_v52 = vpop.permute.xlu0 %403  ;;  %v937_v60 = vstv %s2508_s27  ;;  %s2584_s27 = sld [smem:[#allocation3 + $0x3c]] }
 0x143   : > { %v434_v2 = vpop.permute.xlu2 %433  ;;  %v395_v57 = vadd.f32 %v390_v51, %v381_v35  ;;  %v809_v35 = vmul.f32 %v808_v32, %v2417_v62 }
 0x145   : > { %v409_v1 = vadd.f32 %v404_v52, %v395_v57 }
 0x147   : > { %v423_v7 = vadd.f32 %v418_v40, %v409_v1 }
 0x148   : > { %723 = vrot.lane.b32.xlu1 %v718_v54, %s2087_s24  ;;  %737 = vrot.lane.b32.xlu0 %v732_v55, %s2088_s29  ;;  %v2468_v54 = vld [vmem:[#allocation2 + $0x6] sm:$0xff]  ;;  %v844_v55 = vstv %s2457_s25  ;;  %s2533_s25 = sld [smem:[#allocation3 + $0x35]] }
 0x149   : > { %709 = vrot.lane.b32.xlu2 %v704_v56, %s2086_s23  ;;  %v858_v56 = vstv %s2460_s30  ;;  %s2538_s30 = sld [smem:[#allocation3 + $0x36]] }
 0x14a   : > { %v406_v58 = vpop.permute.xlu1 %405  ;;  %v420_v59 = vpop.permute.xlu0 %419 }
 0x14b   : > { %v460_v61 = vpop.permute.xlu2 %459  ;;  %v410_v8 = vadd.f32 %v406_v58, %v396_v5  ;;  %v845_v58 = vmul.f32 %v844_v55, %v2468_v54  ;;  %v2484_v5 = vld [vmem:[#allocation2 + $0xe] sm:$0xff] }
 0x14c   : > { %v846_v14 = vmul.f32 %v844_v55, %v2484_v5 }
 0x14d   : > { %v424_v17 = vadd.f32 %v420_v59, %v410_v8  ;;  %v859_v59 = vmul.f32 %v858_v56, %v2468_v54 }
 0x14f   : > { %v438_v25 = vadd.f32 %v434_v2, %v424_v17 }
 0x150   : > { %757 = vrot.lane.b32.xlu1 %v753_v3, %s2084_s6  ;;  %771 = vrot.lane.b32.xlu0 %v767_v4, %s2083_s5 }
 0x151   : > { %735 = vrot.lane.b32.xlu2 %v731_v6, %s2088_s29  ;;  %v872_v6 = vstv %s2472_s3  ;;  %s2550_s3 = sld [smem:[#allocation3 + $0x37]] }
 0x152   : > { %v432_v10 = vpop.permute.xlu1 %431  ;;  %v446_v11 = vpop.permute.xlu0 %445 }
 0x153   : > { %v437_v12 = vadd.f32 %v432_v10, %v423_v7  ;;  %v484_v13 = vpop.permute.xlu2 %483  ;;  %v562_v7 = vstv %s2474_s4  ;;  %v860_v10 = vmul.f32 %v858_v56, %v2484_v5  ;;  %v2535_v56 = vld [vmem:[#allocation2 + $0x20] sm:$0xff]  ;;  %s2559_s4 = sld [smem:[#allocation3 + $0x39]] }
 0x155   : > { %v451_v18 = vadd.f32 %v446_v11, %v437_v12  ;;  %v874_v11 = vmul.f32 %v872_v6, %v2484_v5  ;;  %v563_v12 = vmul.f32 %v562_v7, %v2329_v39  ;;  %v564_v39 = vmul.f32 %v562_v7, %v2337_v47 }
 0x157   : > { %v465_v21 = vadd.f32 %v460_v61, %v451_v18 }
 0x158   : > { %773 = vrot.lane.b32.xlu1 %v768_v19, %s2083_s5  ;;  %787 = vrot.lane.b32.xlu0 %v782_v20, %s2085_s15 }
 0x159   : > { %v473_v26 = vadd.f32 %v471_v46, %v465_v21  ;;  %759 = vrot.lane.b32.xlu2 %v754_v22, %s2084_s6  ;;  %v886_v46 = vstv %s2482_s18  ;;  %v900_v21 = vstv %s2487_s20  ;;  %s2562_s18 = sld [smem:[#allocation3 + $0x3a]] }
 0x15a   : > { %v448_v27 = vpop.permute.xlu1 %447  ;;  %v462_v28 = vpop.permute.xlu0 %461  ;;  %s2574_s20 = sld [smem:[#allocation3 + $0x3b]] }
 0x15b   : > { %v452_v29 = vadd.f32 %v448_v27, %v438_v25  ;;  %v510_v30 = vpop.permute.xlu2 %509  ;;  %v887_v25 = vmul.f32 %v886_v46, %v2468_v54 }
 0x15d   : > { %v466_v33 = vadd.f32 %v462_v28, %v452_v29  ;;  %v873_v28 = vmul.f32 %v872_v6, %v2468_v54 }
 0x15f   : > { %v474_v36 = vadd.f32 %v472_v16, %v466_v33  ;;  %v914_v16 = vstv %s2499_s26  ;;  %s2576_s26 = sld [smem:[#allocation3 + $0x23]] }
 0x160   : > { %799 = vrot.lane.b32.xlu1 %v795_v34, %s2086_s23  ;;  %813 = vrot.lane.b32.xlu0 %v809_v35, %s2087_s24  ;;  %v902_v34 = vmul.f32 %v900_v21, %v2484_v5  ;;  %v916_v35 = vmul.f32 %v914_v16, %v2484_v5 }
 0x161   : > { %v488_v38 = vadd.f32 %v484_v13, %v474_v36  ;;  %785 = vrot.lane.b32.xlu2 %v781_v37, %s2085_s15  ;;  %v888_v37 = vmul.f32 %v886_v46, %v2484_v5 }
 0x162   : > { %v482_v40 = vpop.permute.xlu1 %481  ;;  %v496_v41 = vpop.permute.xlu0 %495 }
 0x163   : > { %v487_v23 = vadd.f32 %v482_v40, %v473_v26  ;;  %v526_v43 = vpop.permute.xlu2 %525  ;;  %v901_v26 = vmul.f32 %v900_v21, %v2468_v54 }
 0x165   : > { %v501_v44 = vadd.f32 %v496_v41, %v487_v23 }
 0x167   : > { %v515_v49 = vadd.f32 %v510_v30, %v501_v44  ;;  %v951_v44 = vstv %s2511_s7  ;;  %s2589_s7 = sld [smem:[#allocation3 + $0x3d]] }
 0x168   : > { %815 = vrot.lane.b32.xlu1 %v810_v45, %s2087_s24  ;;  %829 = vrot.lane.b32.xlu0 %v824_v48, %s2088_s29 }
 0x169   : > { %801 = vrot.lane.b32.xlu2 %v796_v50, %s2086_s23 }
 0x16a   : > { %v498_v51 = vpop.permute.xlu1 %497  ;;  %v512_v52 = vpop.permute.xlu0 %511 }
 0x16b   : > { %v502_v2 = vadd.f32 %v498_v51, %v488_v38  ;;  %v552_v53 = vpop.permute.xlu2 %551  ;;  %v915_v51 = vmul.f32 %v914_v16, %v2468_v54  ;;  %v1029_v16 = vstv %s2559_s4  ;;  %s2635_s4 = sld [smem:[#allocation3 + $0x43]] }
 0x16d   : > { %v516_v57 = vadd.f32 %v512_v52, %v502_v2 }
 0x16f   : > { %v530_v61 = vadd.f32 %v526_v43, %v516_v57  ;;  %v2519_v43 = vld [vmem:[#allocation2 + $0x18] sm:$0xff]  ;;  %v965_v57 = vstv %s2523_s8  ;;  %s2601_s8 = sld [smem:[#allocation3 + $0x3e]] }
 0x170   : > { %849 = vrot.lane.b32.xlu1 %v845_v58, %s2084_s6  ;;  %863 = vrot.lane.b32.xlu0 %v859_v59, %s2083_s5  ;;  %v938_v48 = vmul.f32 %v937_v60, %v2519_v43  ;;  %v654_v58 = vstv %s2525_s16  ;;  %s2610_s16 = sld [smem:[#allocation3 + $0x40]] }
 0x171   : > { %827 = vrot.lane.b32.xlu2 %v823_v63, %s2088_s29  ;;  %v967_v63 = vmul.f32 %v965_v57, %v2535_v56 }
 0x172   : > { %v524_v0 = vpop.permute.xlu1 %523  ;;  %v538_v1 = vpop.permute.xlu0 %537 }
 0x173   : > { %v529_v3 = vadd.f32 %v524_v0, %v515_v49  ;;  %v576_v4 = vpop.permute.xlu2 %575  ;;  %v952_v49 = vmul.f32 %v951_v44, %v2519_v43  ;;  %v655_v0 = vmul.f32 %v654_v58, %v2365_v9  ;;  %v656_v9 = vmul.f32 %v654_v58, %v2382_v24 }
 0x175   : > { %v543_v8 = vadd.f32 %v538_v1, %v529_v3  ;;  %v939_v3 = vmul.f32 %v937_v60, %v2535_v56 }
 0x177   : > { %v557_v13 = vadd.f32 %v552_v53, %v543_v8 }
 0x178   : > { %865 = vrot.lane.b32.xlu1 %v860_v10, %s2083_s5  ;;  %879 = vrot.lane.b32.xlu0 %v874_v11, %s2085_s15  ;;  %v979_v11 = vstv %s2533_s25  ;;  %s2613_s25 = sld [smem:[#allocation3 + $0x41]] }
 0x179   : > { %v565_v15 = vadd.f32 %v563_v12, %v557_v13  ;;  %851 = vrot.lane.b32.xlu2 %v846_v14, %s2084_s6  ;;  %v993_v12 = vstv %s2538_s30  ;;  %v980_v14 = vmul.f32 %v979_v11, %v2519_v43  ;;  %s2625_s30 = sld [smem:[#allocation3 + $0x42]] }
 0x17a   : > { %v540_v17 = vpop.permute.xlu1 %539  ;;  %v554_v18 = vpop.permute.xlu0 %553 }
 0x17b   : > { %v544_v19 = vadd.f32 %v540_v17, %v530_v61  ;;  %v602_v20 = vpop.permute.xlu2 %601  ;;  %v953_v61 = vmul.f32 %v951_v44, %v2535_v56  ;;  %v2586_v44 = vld [vmem:[#allocation2 + $0x21] sm:$0xff] }
 0x17d   : > { %v558_v22 = vadd.f32 %v554_v18, %v544_v19  ;;  %v966_v18 = vmul.f32 %v965_v57, %v2519_v43 }
 0x17f   : > { %v566_v27 = vadd.f32 %v564_v39, %v558_v22  ;;  %v1007_v39 = vstv %s2550_s3  ;;  %s2627_s3 = sld [smem:[#allocation3 + $0x2a]] }
 0x180   : > { %891 = vrot.lane.b32.xlu1 %v887_v25, %s2086_s23  ;;  %905 = vrot.lane.b32.xlu0 %v901_v26, %s2087_s24  ;;  %v995_v25 = vmul.f32 %v993_v12, %v2535_v56  ;;  %v1009_v26 = vmul.f32 %v1007_v39, %v2535_v56 }
 0x181   : > { %v580_v29 = vadd.f32 %v576_v4, %v566_v27  ;;  %877 = vrot.lane.b32.xlu2 %v873_v28, %s2085_s15  ;;  %v981_v28 = vmul.f32 %v979_v11, %v2535_v56 }
 0x182   : > { %v574_v30 = vpop.permute.xlu1 %573  ;;  %v588_v31 = vpop.permute.xlu0 %587 }
 0x183   : > { %v579_v47 = vadd.f32 %v574_v30, %v565_v15  ;;  %v618_v32 = vpop.permute.xlu2 %617  ;;  %v994_v15 = vmul.f32 %v993_v12, %v2519_v43 }
 0x185   : > { %v593_v33 = vadd.f32 %v588_v31, %v579_v47 }
 0x187   : > { %v607_v36 = vadd.f32 %v602_v20, %v593_v33  ;;  %v1043_v33 = vstv %s2562_s18  ;;  %s2640_s18 = sld [smem:[#allocation3 + $0x44]] }
 0x188   : > { %907 = vrot.lane.b32.xlu1 %v902_v34, %s2087_s24  ;;  %921 = vrot.lane.b32.xlu0 %v916_v35, %s2088_s29 }
 0x189   : > { %893 = vrot.lane.b32.xlu2 %v888_v37, %s2086_s23 }
 0x18a   : > { %v590_v38 = vpop.permute.xlu1 %589  ;;  %v604_v40 = vpop.permute.xlu0 %603 }
 0x18b   : > { %v594_v41 = vadd.f32 %v590_v38, %v580_v29  ;;  %v644_v23 = vpop.permute.xlu2 %643  ;;  %v1008_v38 = vmul.f32 %v1007_v39, %v2519_v43  ;;  %v1121_v39 = vstv %s2610_s16  ;;  %s2686_s16 = sld [smem:[#allocation3 + $0x4a]] }
 0x18d   : > { %v608_v45 = vadd.f32 %v604_v40, %v594_v41 }
 0x18f   : > { %v622_v50 = vadd.f32 %v618_v32, %v608_v45  ;;  %v2570_v32 = vld [vmem:[#allocation2 + $0x19] sm:$0xff]  ;;  %v1057_v45 = vstv %s2574_s20  ;;  %s2652_s20 = sld [smem:[#allocation3 + $0x45]] }
 0x190   : > { %942 = vrot.lane.b32.xlu1 %v938_v48, %s2084_s6  ;;  %956 = vrot.lane.b32.xlu0 %v952_v49, %s2083_s5  ;;  %v1030_v35 = vmul.f32 %v1029_v16, %v2570_v32  ;;  %v746_v48 = vstv %s2576_s26  ;;  %s2661_s26 = sld [smem:[#allocation3 + $0x47]] }
 0x191   : > { %919 = vrot.lane.b32.xlu2 %v915_v51, %s2088_s29  ;;  %v1059_v51 = vmul.f32 %v1057_v45, %v2586_v44 }
 0x192   : > { %v616_v52 = vpop.permute.xlu1 %615  ;;  %v630_v2 = vpop.permute.xlu0 %629 }
 0x193   : > { %v621_v53 = vadd.f32 %v616_v52, %v607_v36  ;;  %v668_v55 = vpop.permute.xlu2 %667  ;;  %v1044_v36 = vmul.f32 %v1043_v33, %v2570_v32  ;;  %v747_v52 = vmul.f32 %v746_v48, %v2417_v62  ;;  %v748_v62 = vmul.f32 %v746_v48, %v2433_v42 }
 0x195   : > { %v635_v59 = vadd.f32 %v630_v2, %v621_v53  ;;  %v1031_v53 = vmul.f32 %v1029_v16, %v2586_v44 }
 0x197   : > { %v649_v1 = vadd.f32 %v644_v23, %v635_v59 }
 0x198   : > { %958 = vrot.lane.b32.xlu1 %v953_v61, %s2083_s5  ;;  %972 = vrot.lane.b32.xlu0 %v967_v63, %s2085_s15  ;;  %v1071_v63 = vstv %s2584_s27  ;;  %s2664_s27 = sld [smem:[#allocation3 + $0x48]] }
 0x199   : > { %v657_v4 = vadd.f32 %v655_v0, %v649_v1  ;;  %944 = vrot.lane.b32.xlu2 %v939_v3, %s2084_s6  ;;  %v1085_v0 = vstv %s2589_s7  ;;  %v1072_v3 = vmul.f32 %v1071_v63, %v2570_v32  ;;  %s2676_s7 = sld [smem:[#allocation3 + $0x31]] }
 0x19a   : > { %v632_v6 = vpop.permute.xlu1 %631  ;;  %v646_v7 = vpop.permute.xlu0 %645 }
 0x19b   : > { %v636_v8 = vadd.f32 %v632_v6, %v622_v50  ;;  %v694_v10 = vpop.permute.xlu2 %693  ;;  %v1045_v50 = vmul.f32 %v1043_v33, %v2586_v44  ;;  %v2637_v33 = vld [vmem:[#allocation2 + $0x22] sm:$0xff] }
 0x19d   : > { %v650_v13 = vadd.f32 %v646_v7, %v636_v8  ;;  %v1058_v7 = vmul.f32 %v1057_v45, %v2570_v32 }
 0x19f   : > { %v658_v17 = vadd.f32 %v656_v9, %v650_v13  ;;  %v1099_v9 = vstv %s2601_s8  ;;  %s2678_s8 = sld [smem:[#allocation3 + $0x49]] }
 0x1a0   : > { %984 = vrot.lane.b32.xlu1 %v980_v14, %s2086_s23  ;;  %998 = vrot.lane.b32.xlu0 %v994_v15, %s2087_s24  ;;  %v1087_v14 = vmul.f32 %v1085_v0, %v2586_v44  ;;  %v1101_v15 = vmul.f32 %v1099_v9, %v2586_v44 }
 0x1a1   : > { %v672_v19 = vadd.f32 %v668_v55, %v658_v17  ;;  %970 = vrot.lane.b32.xlu2 %v966_v18, %s2085_s15  ;;  %v1073_v18 = vmul.f32 %v1071_v63, %v2586_v44 }
 0x1a2   : > { %v666_v20 = vpop.permute.xlu1 %665  ;;  %v680_v46 = vpop.permute.xlu0 %679 }
 0x1a3   : > { %v671_v24 = vadd.f32 %v666_v20, %v657_v4  ;;  %v710_v21 = vpop.permute.xlu2 %709  ;;  %v1086_v4 = vmul.f32 %v1085_v0, %v2570_v32 }
 0x1a5   : > { %v685_v22 = vadd.f32 %v680_v46, %v671_v24 }
 0x1a7   : > { %v699_v27 = vadd.f32 %v694_v10, %v685_v22  ;;  %v1135_v22 = vstv %s2613_s25  ;;  %s2690_s25 = sld [smem:[#allocation3 + $0x4b]] }
 0x1a8   : > { %1000 = vrot.lane.b32.xlu1 %v995_v25, %s2087_s24  ;;  %1014 = vrot.lane.b32.xlu0 %v1009_v26, %s2088_s29 }
 0x1a9   : > { %986 = vrot.lane.b32.xlu2 %v981_v28, %s2086_s23 }
 0x1aa   : > { %v682_v29 = vpop.permute.xlu1 %681  ;;  %v696_v30 = vpop.permute.xlu0 %695 }
 0x1ab   : > { %v686_v31 = vadd.f32 %v682_v29, %v672_v19  ;;  %v736_v47 = vpop.permute.xlu2 %735  ;;  %v1100_v29 = vmul.f32 %v1099_v9, %v2570_v32  ;;  %v1213_v9 = vstv %s2661_s26  ;;  %s2737_s26 = sld [smem:[#allocation3 + $0x51]] }
 0x1ad   : > { %v700_v34 = vadd.f32 %v696_v30, %v686_v31 }
 0x1af   : > { %v714_v37 = vadd.f32 %v710_v21, %v700_v34  ;;  %v2621_v21 = vld [vmem:[#allocation2 + $0x1a] sm:$0xff]  ;;  %v1149_v34 = vstv %s2625_s30  ;;  %s2704_s30 = sld [smem:[#allocation3 + $0x4c]] }
 0x1b0   : > { %1034 = vrot.lane.b32.xlu1 %v1030_v35, %s2084_s6  ;;  %1048 = vrot.lane.b32.xlu0 %v1044_v36, %s2083_s5  ;;  %v1122_v26 = vmul.f32 %v1121_v39, %v2621_v21  ;;  %v838_v35 = vstv %s2627_s3  ;;  %s2712_s3 = sld [smem:[#allocation3 + $0x4e]] }
 0x1b1   : > { %1012 = vrot.lane.b32.xlu2 %v1008_v38, %s2088_s29  ;;  %v1151_v38 = vmul.f32 %v1149_v34, %v2637_v33 }
 0x1b2   : > { %v708_v40 = vpop.permute.xlu1 %707  ;;  %v722_v41 = vpop.permute.xlu0 %721 }
 0x1b3   : > { %v713_v23 = vadd.f32 %v708_v40, %v699_v27  ;;  %v760_v60 = vpop.permute.xlu2 %759  ;;  %v1136_v27 = vmul.f32 %v1135_v22, %v2621_v21  ;;  %v839_v40 = vmul.f32 %v838_v35, %v2468_v54  ;;  %v840_v54 = vmul.f32 %v838_v35, %v2484_v5 }
 0x1b5   : > { %v727_v49 = vadd.f32 %v722_v41, %v713_v23  ;;  %v1123_v23 = vmul.f32 %v1121_v39, %v2637_v33 }
 0x1b7   : > { %v741_v2 = vadd.f32 %v736_v47, %v727_v49 }
 0x1b8   : > { %1050 = vrot.lane.b32.xlu1 %v1045_v50, %s2083_s5  ;;  %1064 = vrot.lane.b32.xlu0 %v1059_v51, %s2085_s15  ;;  %v1163_v51 = vstv %s2635_s4  ;;  %s2714_s4 = sld [smem:[#allocation3 + $0x4f]] }
 0x1b9   : > { %v749_v55 = vadd.f32 %v747_v52, %v741_v2  ;;  %1036 = vrot.lane.b32.xlu2 %v1031_v53, %s2084_s6  ;;  %v1177_v52 = vstv %s2640_s18  ;;  %v1164_v53 = vmul.f32 %v1163_v51, %v2621_v21  ;;  %s2727_s18 = sld [smem:[#allocation3 + $0x38]] }
 0x1ba   : > { %v724_v57 = vpop.permute.xlu1 %723  ;;  %v738_v58 = vpop.permute.xlu0 %737 }
 0x1bb   : > { %v728_v59 = vadd.f32 %v724_v57, %v714_v37  ;;  %v786_v61 = vpop.permute.xlu2 %785  ;;  %v1137_v37 = vmul.f32 %v1135_v22, %v2637_v33  ;;  %v2688_v22 = vld [vmem:[#allocation2 + $0x23] sm:$0xff] }
 0x1bd   : > { %v742_v1 = vadd.f32 %v738_v58, %v728_v59  ;;  %v1150_v58 = vmul.f32 %v1149_v34, %v2621_v21 }
 0x1bf   : > { %v750_v6 = vadd.f32 %v748_v62, %v742_v1  ;;  %v1191_v62 = vstv %s2652_s20  ;;  %s2729_s20 = sld [smem:[#allocation3 + $0x50]] }
 0x1c0   : > { %1076 = vrot.lane.b32.xlu1 %v1072_v3, %s2086_s23  ;;  %1090 = vrot.lane.b32.xlu0 %v1086_v4, %s2087_s24  ;;  %v1179_v3 = vmul.f32 %v1177_v52, %v2637_v33  ;;  %v1193_v4 = vmul.f32 %v1191_v62, %v2637_v33 }
 0x1c1   : > { %v764_v8 = vadd.f32 %v760_v60, %v750_v6  ;;  %1062 = vrot.lane.b32.xlu2 %v1058_v7, %s2085_s15  ;;  %v1165_v7 = vmul.f32 %v1163_v51, %v2637_v33 }
 0x1c2   : > { %v758_v10 = vpop.permute.xlu1 %757  ;;  %v772_v11 = vpop.permute.xlu0 %771 }
 0x1c3   : > { %v763_v42 = vadd.f32 %v758_v10, %v749_v55  ;;  %v802_v12 = vpop.permute.xlu2 %801  ;;  %v1178_v55 = vmul.f32 %v1177_v52, %v2621_v21 }
 0x1c5   : > { %v777_v13 = vadd.f32 %v772_v11, %v763_v42 }
 0x1c7   : > { %v791_v17 = vadd.f32 %v786_v61, %v777_v13  ;;  %v1227_v13 = vstv %s2664_s27  ;;  %s2741_s27 = sld [smem:[#allocation3 + $0x52]] }
 0x1c8   : > { %1092 = vrot.lane.b32.xlu1 %v1087_v14, %s2087_s24  ;;  %1106 = vrot.lane.b32.xlu0 %v1101_v15, %s2088_s29 }
 0x1c9   : > { %1078 = vrot.lane.b32.xlu2 %v1073_v18, %s2086_s23 }
 0x1ca   : > { %v774_v19 = vpop.permute.xlu1 %773  ;;  %v788_v20 = vpop.permute.xlu0 %787 }
 0x1cb   : > { %v778_v46 = vadd.f32 %v774_v19, %v764_v8  ;;  %v828_v24 = vpop.permute.xlu2 %827  ;;  %v1192_v19 = vmul.f32 %v1191_v62, %v2621_v21  ;;  %v1305_v62 = vstv %s2712_s3  ;;  %s2788_s3 = sld [smem:[#allocation3 + $0x58]] }
 0x1cd   : > { %v792_v25 = vadd.f32 %v788_v20, %v778_v46 }
 0x1cf   : > { %v806_v28 = vadd.f32 %v802_v12, %v792_v25  ;;  %v2672_v12 = vld [vmem:[#allocation2 + $0x1b] sm:$0xff]  ;;  %v931_v25 = vstv %s2676_s7  ;;  %s2755_s7 = sld [smem:[#allocation3 + $0x53]] }
 0x1d0   : > { %1126 = vrot.lane.b32.xlu1 %v1122_v26, %s2084_s6  ;;  %1140 = vrot.lane.b32.xlu0 %v1136_v27, %s2083_s5  ;;  %v1214_v15 = vmul.f32 %v1213_v9, %v2672_v12  ;;  %v1241_v27 = vstv %s2678_s8  ;;  %s2763_s8 = sld [smem:[#allocation3 + $0x55]] }
 0x1d1   : > { %1104 = vrot.lane.b32.xlu2 %v1100_v29, %s2088_s29  ;;  %v1243_v29 = vmul.f32 %v1241_v27, %v2688_v22 }
 0x1d2   : > { %v800_v30 = vpop.permute.xlu1 %799  ;;  %v814_v31 = vpop.permute.xlu0 %813 }
 0x1d3   : > { %v805_v47 = vadd.f32 %v800_v30, %v791_v17  ;;  %v852_v16 = vpop.permute.xlu2 %851  ;;  %v1228_v17 = vmul.f32 %v1227_v13, %v2672_v12 }
 0x1d5   : > { %v819_v36 = vadd.f32 %v814_v31, %v805_v47  ;;  %v1215_v31 = vmul.f32 %v1213_v9, %v2688_v22  ;;  %v932_v47 = vmul.f32 %v931_v25, %v2519_v43 }
 0x1d7   : > { %v833_v41 = vadd.f32 %v828_v24, %v819_v36 }
 0x1d8   : > { %1142 = vrot.lane.b32.xlu1 %v1137_v37, %s2083_s5  ;;  %1156 = vrot.lane.b32.xlu0 %v1151_v38, %s2085_s15  ;;  %v1255_v38 = vstv %s2686_s16  ;;  %s2765_s16 = sld [smem:[#allocation3 + $0x56]] }
 0x1d9   : > { %v841_v60 = vadd.f32 %v839_v40, %v833_v41  ;;  %1128 = vrot.lane.b32.xlu2 %v1123_v23, %s2084_s6  ;;  %v1269_v40 = vstv %s2690_s25  ;;  %v933_v41 = vmul.f32 %v931_v25, %v2535_v56  ;;  %v1256_v43 = vmul.f32 %v1255_v38, %v2672_v12  ;;  %s2778_s25 = sld [smem:[#allocation3 + $0x3f]] }
 0x1da   : > { %v816_v45 = vpop.permute.xlu1 %815  ;;  %v830_v48 = vpop.permute.xlu0 %829 }
 0x1db   : > { %v820_v49 = vadd.f32 %v816_v45, %v806_v28  ;;  %v878_v50 = vpop.permute.xlu2 %877  ;;  %v1229_v28 = vmul.f32 %v1227_v13, %v2688_v22  ;;  %v2739_v13 = vld [vmem:[#allocation2 + $0x24] sm:$0xff] }
 0x1dd   : > { %v834_v2 = vadd.f32 %v830_v48, %v820_v49  ;;  %v1242_v48 = vmul.f32 %v1241_v27, %v2672_v12 }
 0x1df   : > { %v842_v57 = vadd.f32 %v840_v54, %v834_v2  ;;  %v1283_v2 = vstv %s2704_s30  ;;  %s2780_s30 = sld [smem:[#allocation3 + $0x57]] }
 0x1e0   : > { %1168 = vrot.lane.b32.xlu1 %v1164_v53, %s2086_s23  ;;  %1182 = vrot.lane.b32.xlu0 %v1178_v55, %s2087_s24  ;;  %v1271_v53 = vmul.f32 %v1269_v40, %v2688_v22  ;;  %v1285_v55 = vmul.f32 %v1283_v2, %v2688_v22 }
 0x1e1   : > { %v856_v59 = vadd.f32 %v852_v16, %v842_v57  ;;  %1154 = vrot.lane.b32.xlu2 %v1150_v58, %s2085_s15  ;;  %v1257_v57 = vmul.f32 %v1255_v38, %v2688_v22 }
 0x1e2   : > { %v850_v61 = vpop.permute.xlu1 %849  ;;  %v864_v63 = vpop.permute.xlu0 %863 }
 0x1e3   : > { %v855_v5 = vadd.f32 %v850_v61, %v841_v60  ;;  %v894_v0 = vpop.permute.xlu2 %893  ;;  %v1270_v60 = vmul.f32 %v1269_v40, %v2672_v12 }
 0x1e5   : > { %v869_v1 = vadd.f32 %v864_v63, %v855_v5 }
 0x1e7   : > { %v883_v6 = vadd.f32 %v878_v50, %v869_v1  ;;  %v1319_v1 = vstv %s2714_s4  ;;  %s2792_s4 = sld [smem:[#allocation3 + $0x59]] }
 0x1e8   : > { %1184 = vrot.lane.b32.xlu1 %v1179_v3, %s2087_s24  ;;  %1198 = vrot.lane.b32.xlu0 %v1193_v4, %s2088_s29 }
 0x1e9   : > { %1170 = vrot.lane.b32.xlu2 %v1165_v7, %s2086_s23  ;;  %v1284_v7 = vmul.f32 %v1283_v2, %v2672_v12  ;;  %v1411_v2 = vstv %s2765_s16  ;;  %s2843_s16 = sld [smem:[#allocation3 + $0x60]] }
 0x1ea   : > { %v866_v8 = vpop.permute.xlu1 %865  ;;  %v880_v10 = vpop.permute.xlu0 %879 }
 0x1eb   : > { %v870_v11 = vadd.f32 %v866_v8, %v856_v59  ;;  %v920_v42 = vpop.permute.xlu2 %919 }
 0x1ed   : > { %v884_v14 = vadd.f32 %v880_v10, %v870_v11 }
 0x1ef   : > { %v898_v18 = vadd.f32 %v894_v0, %v884_v14  ;;  %v2723_v0 = vld [vmem:[#allocation2 + $0x1c] sm:$0xff]  ;;  %v1023_v14 = vstv %s2727_s18  ;;  %s2806_s18 = sld [smem:[#allocation3 + $0x5a]] }
 0x1f0   : > { %1218 = vrot.lane.b32.xlu1 %v1214_v15, %s2084_s6  ;;  %1232 = vrot.lane.b32.xlu0 %v1228_v17, %s2083_s5  ;;  %v1306_v4 = vmul.f32 %v1305_v62, %v2723_v0  ;;  %v1333_v17 = vstv %s2729_s20  ;;  %s2814_s20 = sld [smem:[#allocation3 + $0x5c]] }
 0x1f1   : > { %1196 = vrot.lane.b32.xlu2 %v1192_v19, %s2088_s29  ;;  %v1335_v19 = vmul.f32 %v1333_v17, %v2739_v13 }
 0x1f2   : > { %v892_v20 = vpop.permute.xlu1 %891  ;;  %v906_v46 = vpop.permute.xlu0 %905 }
 0x1f3   : > { %v897_v24 = vadd.f32 %v892_v20, %v883_v6  ;;  %v945_v39 = vpop.permute.xlu2 %944  ;;  %v1320_v6 = vmul.f32 %v1319_v1, %v2723_v0 }
 0x1f5   : > { %v911_v26 = vadd.f32 %v906_v46, %v897_v24  ;;  %v1307_v46 = vmul.f32 %v1305_v62, %v2739_v13  ;;  %v1024_v24 = vmul.f32 %v1023_v14, %v2570_v32 }
 0x1f7   : > { %v925_v30 = vadd.f32 %v920_v42, %v911_v26 }
 0x1f8   : > { %1234 = vrot.lane.b32.xlu1 %v1229_v28, %s2083_s5  ;;  %1248 = vrot.lane.b32.xlu0 %v1243_v29, %s2085_s15  ;;  %v1347_v29 = vstv %s2737_s26  ;;  %s2816_s26 = sld [smem:[#allocation3 + $0x5d]] }
 0x1f9   : > { %1220 = vrot.lane.b32.xlu2 %v1215_v31, %s2084_s6  ;;  %v934_v16 = vadd.f32 %v932_v47, %v925_v30  ;;  %v1361_v30 = vstv %s2741_s27  ;;  %v1025_v31 = vmul.f32 %v1023_v14, %v2586_v44  ;;  %v1348_v32 = vmul.f32 %v1347_v29, %v2723_v0  ;;  %s2829_s27 = sld [smem:[#allocation3 + $0x46]] }
 0x1fa   : > { %v908_v34 = vpop.permute.xlu1 %907  ;;  %v922_v35 = vpop.permute.xlu0 %921 }
 0x1fb   : > { %v912_v36 = vadd.f32 %v908_v34, %v898_v18  ;;  %v971_v37 = vpop.permute.xlu2 %970  ;;  %v1321_v18 = vmul.f32 %v1319_v1, %v2739_v13  ;;  %v2790_v1 = vld [vmem:[#allocation2 + $0x25] sm:$0xff] }
 0x1fd   : > { %v926_v23 = vadd.f32 %v922_v35, %v912_v36  ;;  %v1334_v35 = vmul.f32 %v1333_v17, %v2723_v0 }
 0x1ff   : > { %v935_v45 = vadd.f32 %v933_v41, %v926_v23  ;;  %v1375_v23 = vstv %s2755_s7  ;;  %s2831_s7 = sld [smem:[#allocation3 + $0x5e]] }
 0x200   : > { %1260 = vrot.lane.b32.xlu1 %v1256_v43, %s2086_s23  ;;  %1274 = vrot.lane.b32.xlu0 %v1270_v60, %s2087_s24  ;;  %v1363_v43 = vmul.f32 %v1361_v30, %v2739_v13  ;;  %v1377_v60 = vmul.f32 %v1375_v23, %v2739_v13 }
 0x201   : > { %1246 = vrot.lane.b32.xlu2 %v1242_v48, %s2085_s15  ;;  %v949_v49 = vadd.f32 %v945_v39, %v935_v45  ;;  %v1349_v45 = vmul.f32 %v1347_v29, %v2739_v13 }
 0x202   : > { %v943_v50 = vpop.permute.xlu1 %942  ;;  %v957_v56 = vpop.permute.xlu0 %956 }
 0x203   : > { %v948_v51 = vadd.f32 %v943_v50, %v934_v16  ;;  %v987_v52 = vpop.permute.xlu2 %986  ;;  %v1362_v16 = vmul.f32 %v1361_v30, %v2723_v0 }
 0x205   : > { %v962_v54 = vadd.f32 %v957_v56, %v948_v51 }
 0x207   : > { %v976_v58 = vadd.f32 %v971_v37, %v962_v54  ;;  %v1397_v54 = vstv %s2763_s8  ;;  %s2839_s8 = sld [smem:[#allocation3 + $0x5f]] }
 0x208   : > { %1276 = vrot.lane.b32.xlu1 %v1271_v53, %s2087_s24  ;;  %1290 = vrot.lane.b32.xlu0 %v1285_v55, %s2088_s29 }
 0x209   : > { %1262 = vrot.lane.b32.xlu2 %v1257_v57, %s2086_s23 }
 0x20a   : > { %v959_v59 = vpop.permute.xlu1 %958  ;;  %v973_v61 = vpop.permute.xlu0 %972 }
 0x20b   : > { %v963_v63 = vadd.f32 %v959_v59, %v949_v49  ;;  %v1013_v5 = vpop.permute.xlu2 %1012 }
 0x20d   : > { %v977_v3 = vadd.f32 %v973_v61, %v963_v63 }
 0x20f   : > { %v991_v8 = vadd.f32 %v987_v52, %v977_v3  ;;  %v2774_v52 = vld [vmem:[#allocation2 + $0x1d] sm:$0xff]  ;;  %v1115_v3 = vstv %s2778_s25  ;;  %s1842_s25 = sld [smem:[#allocation3 + $0x61]] }
 0x210   : > { %1310 = vrot.lane.b32.xlu1 %v1306_v4, %s2084_s6  ;;  %1324 = vrot.lane.b32.xlu0 %v1320_v6, %s2083_s5  ;;  %v1398_v55 = vmul.f32 %v1397_v54, %v2774_v52  ;;  %v1412_v57 = vmul.f32 %v1411_v2, %v2774_v52  ;;  %v1425_v6 = vstv %s2780_s30 }
 0x211   : > { %1288 = vrot.lane.b32.xlu2 %v1284_v7, %s2088_s29  ;;  %v1413_v7 = vmul.f32 %v1411_v2, %v2790_v1  ;;  %v2841_v2 = vld [vmem:[#allocation2 + $0x26] sm:$0xff] }
 0x212   : > { %v985_v10 = vpop.permute.xlu1 %984  ;;  %v999_v11 = vpop.permute.xlu0 %998 }
 0x213   : > { %v990_v42 = vadd.f32 %v985_v10, %v976_v58  ;;  %v1037_v9 = vpop.permute.xlu2 %1036  ;;  %v1376_v58 = vmul.f32 %v1375_v23, %v2723_v0  ;;  %v1503_v23 = vstv %s2816_s26 }
 0x215   : > { %v1004_v15 = vadd.f32 %v999_v11, %v990_v42  ;;  %v1399_v11 = vmul.f32 %v1397_v54, %v2790_v1  ;;  %v1116_v42 = vmul.f32 %v1115_v3, %v2621_v21 }
 0x217   : > { %v1018_v20 = vadd.f32 %v1013_v5, %v1004_v15 }
 0x218   : > { %1326 = vrot.lane.b32.xlu1 %v1321_v18, %s2083_s5  ;;  %1340 = vrot.lane.b32.xlu0 %v1335_v19, %s2085_s15  ;;  %v1439_v19 = vstv %s2788_s3 }
 0x219   : > { %1312 = vrot.lane.b32.xlu2 %v1307_v46, %s2084_s6  ;;  %v1026_v39 = vadd.f32 %v1024_v24, %v1018_v20  ;;  %v1453_v20 = vstv %s2792_s4  ;;  %v1117_v46 = vmul.f32 %v1115_v3, %v2637_v33  ;;  %v1440_v21 = vmul.f32 %v1439_v19, %v2774_v52 }
 0x21a   : > { %v1001_v25 = vpop.permute.xlu1 %1000  ;;  %v1015_v26 = vpop.permute.xlu0 %1014 }
 0x21b   : > { %v1005_v27 = vadd.f32 %v1001_v25, %v991_v8  ;;  %v1063_v28 = vpop.permute.xlu2 %1062  ;;  %v1427_v8 = vmul.f32 %v1425_v6, %v2790_v1 }
 0x21d   : > { %v1019_v47 = vadd.f32 %v1015_v26, %v1005_v27  ;;  %v1426_v26 = vmul.f32 %v1425_v6, %v2774_v52 }
 0x21f   : > { %v1027_v34 = vadd.f32 %v1025_v31, %v1019_v47  ;;  %v1467_v47 = vstv %s2806_s18 }
 0x220   : > { %1352 = vrot.lane.b32.xlu1 %v1348_v32, %s2086_s23  ;;  %1366 = vrot.lane.b32.xlu0 %v1362_v16, %s2087_s24  ;;  %v1455_v32 = vmul.f32 %v1453_v20, %v2790_v1  ;;  %v1469_v16 = vmul.f32 %v1467_v47, %v2790_v1 }
 0x221   : > { %1338 = vrot.lane.b32.xlu2 %v1334_v35, %s2085_s15  ;;  %v1041_v36 = vadd.f32 %v1037_v9, %v1027_v34  ;;  %v1441_v34 = vmul.f32 %v1439_v19, %v2790_v1 }
 0x222   : > { %v1035_v37 = vpop.permute.xlu1 %1034  ;;  %v1049_v44 = vpop.permute.xlu0 %1048 }
 0x223   : > { %v1040_v38 = vadd.f32 %v1035_v37, %v1026_v39  ;;  %v1079_v40 = vpop.permute.xlu2 %1078  ;;  %v1454_v39 = vmul.f32 %v1453_v20, %v2774_v52 }
 0x225   : > { %v1054_v41 = vadd.f32 %v1049_v44, %v1040_v38 }
 0x227   : > { %v1068_v48 = vadd.f32 %v1063_v28, %v1054_v41  ;;  %v1489_v41 = vstv %s2814_s20  ;;  %s1613_s20 = scalar_lea.sflag [#allocation5], %s2211_s17 }
 0x228   : > { %1368 = vrot.lane.b32.xlu1 %v1363_v43, %s2087_s24  ;;  %1382 = vrot.lane.b32.xlu0 %v1377_v60, %s2088_s29 }
 0x229   : > { %1354 = vrot.lane.b32.xlu2 %v1349_v45, %s2086_s23 }
 0x22a   : > { %v1051_v49 = vpop.permute.xlu1 %1050  ;;  %v1065_v50 = vpop.permute.xlu0 %1064 }
 0x22b   : > { %v1055_v56 = vadd.f32 %v1051_v49, %v1041_v36  ;;  %v1105_v51 = vpop.permute.xlu2 %1104 }
 0x22d   : > { %v1069_v53 = vadd.f32 %v1065_v50, %v1055_v56 }
 0x22f   : > { %v1083_v59 = vadd.f32 %v1079_v40, %v1069_v53  ;;  %v2825_v40 = vld [vmem:[#allocation2 + $0x1e] sm:$0xff]  ;;  %v1207_v53 = vstv %s2829_s27 }
 0x230   : > { %1402 = vrot.lane.b32.xlu1 %v1398_v55, %s2084_s6  ;;  %1416 = vrot.lane.b32.xlu0 %v1412_v57, %s2083_s5  ;;  %v1490_v60 = vmul.f32 %v1489_v41, %v2825_v40  ;;  %v1504_v45 = vmul.f32 %v1503_v23, %v2825_v40  ;;  %v1517_v57 = vstv %s2831_s7 }
 0x231   : > { %1380 = vrot.lane.b32.xlu2 %v1376_v58, %s2088_s29  ;;  %v1505_v58 = vmul.f32 %v1503_v23, %v2841_v2 }
 0x232   : > { %v1077_v61 = vpop.permute.xlu1 %1076  ;;  %v1091_v63 = vpop.permute.xlu0 %1090 }
 0x233   : > { %v1082_v5 = vadd.f32 %v1077_v61, %v1068_v48  ;;  %v1129_v62 = vpop.permute.xlu2 %1128  ;;  %v1468_v48 = vmul.f32 %v1467_v47, %v2774_v52 }
 0x235   : > { %v1096_v4 = vadd.f32 %v1091_v63, %v1082_v5  ;;  %v1491_v63 = vmul.f32 %v1489_v41, %v2841_v2  ;;  %v1208_v5 = vmul.f32 %v1207_v53, %v2672_v12 }
 0x237   : > { %v1110_v10 = vadd.f32 %v1105_v51, %v1096_v4 }
 0x238   : > { %1418 = vrot.lane.b32.xlu1 %v1413_v7, %s2083_s5  ;;  %1432 = vrot.lane.b32.xlu0 %v1427_v8, %s2085_s15  ;;  %v1531_v8 = vstv %s2839_s8 }
 0x239   : > { %1404 = vrot.lane.b32.xlu2 %v1399_v11, %s2084_s6  ;;  %v1118_v9 = vadd.f32 %v1116_v42, %v1110_v10  ;;  %v1545_v10 = vstv %s2843_s16  ;;  %v1209_v11 = vmul.f32 %v1207_v53, %v2688_v22  ;;  %s2010_s16 = scalar_lea.hbm %s2920_s2, 32 }
 0x23a   : > { %v1093_v14 = vpop.permute.xlu1 %1092  ;;  %v1107_v15 = vpop.permute.xlu0 %1106  ;;  %v1546_v12 = vmul.f32 %v1545_v10, %v2825_v40 }
 0x23b   : > { %v1097_v17 = vadd.f32 %v1093_v14, %v1083_v59  ;;  %v1155_v18 = vpop.permute.xlu2 %1154  ;;  %v1519_v59 = vmul.f32 %v1517_v57, %v2841_v2 }
 0x23d   : > { %v1111_v24 = vadd.f32 %v1107_v15, %v1097_v17  ;;  %v1518_v15 = vmul.f32 %v1517_v57, %v2825_v40 }
 0x23f   : > { %v1119_v25 = vadd.f32 %v1117_v46, %v1111_v24  ;;  %v1559_v24 = vstv %s1842_s25 }
 0x240   : > { %1444 = vrot.lane.b32.xlu1 %v1440_v21, %s2086_s23  ;;  %1458 = vrot.lane.b32.xlu0 %v1454_v39, %s2087_s24  ;;  %v1547_v21 = vmul.f32 %v1545_v10, %v2841_v2  ;;  %v1561_v39 = vmul.f32 %v1559_v24, %v2841_v2 }
 0x241   : > { %1430 = vrot.lane.b32.xlu2 %v1426_v26, %s2085_s15  ;;  %v1133_v27 = vadd.f32 %v1129_v62, %v1119_v25  ;;  %v1533_v25 = vmul.f32 %v1531_v8, %v2841_v2 }
 0x242   : > { %v1127_v28 = vpop.permute.xlu1 %1126  ;;  %v1141_v33 = vpop.permute.xlu0 %1140 }
 0x243   : > { %v1132_v29 = vadd.f32 %v1127_v28, %v1118_v9  ;;  %v1171_v30 = vpop.permute.xlu2 %1170  ;;  %v1532_v9 = vmul.f32 %v1531_v8, %v2825_v40 }
 0x245   : > { %v1146_v31 = vadd.f32 %v1141_v33, %v1132_v29 }
 0x247   : > { %v1160_v35 = vadd.f32 %v1155_v18, %v1146_v31  ;;  %v1560_v31 = vmul.f32 %v1559_v24, %v2825_v40 }
 0x248   : > { %1460 = vrot.lane.b32.xlu1 %v1455_v32, %s2087_s24  ;;  %1474 = vrot.lane.b32.xlu0 %v1469_v16, %s2088_s29 }
 0x249   : > { %1446 = vrot.lane.b32.xlu2 %v1441_v34, %s2086_s23 }
 0x24a   : > { %v1143_v36 = vpop.permute.xlu1 %1142  ;;  %v1157_v37 = vpop.permute.xlu0 %1156 }
 0x24b   : > { %v1147_v44 = vadd.f32 %v1143_v36, %v1133_v27  ;;  %v1197_v38 = vpop.permute.xlu2 %1196 }
 0x24d   : > { %v1161_v43 = vadd.f32 %v1157_v37, %v1147_v44 }
 0x24f   : > { %v1175_v49 = vadd.f32 %v1171_v30, %v1161_v43 }
 0x250   : > { %1494 = vrot.lane.b32.xlu1 %v1490_v60, %s2084_s6  ;;  %1508 = vrot.lane.b32.xlu0 %v1504_v45, %s2083_s5 }
 0x251   : > { %1472 = vrot.lane.b32.xlu2 %v1468_v48, %s2088_s29 }
 0x252   : > { %v1169_v50 = vpop.permute.xlu1 %1168  ;;  %v1183_v56 = vpop.permute.xlu0 %1182 }
 0x253   : > { %v1174_v51 = vadd.f32 %v1169_v50, %v1160_v35  ;;  %v1221_v54 = vpop.permute.xlu2 %1220 }
 0x255   : > { %v1188_v55 = vadd.f32 %v1183_v56, %v1174_v51 }
 0x257   : > { %v1202_v61 = vadd.f32 %v1197_v38, %v1188_v55 }
 0x258   : > { %1510 = vrot.lane.b32.xlu1 %v1505_v58, %s2083_s5  ;;  %1524 = vrot.lane.b32.xlu0 %v1519_v59, %s2085_s15  ;;  %s1822_s5 = sld [smem:[#allocation3 + $0x4d]] }
 0x259   : > { %1496 = vrot.lane.b32.xlu2 %v1491_v63, %s2084_s6  ;;  %v1210_v62 = vadd.f32 %v1208_v5, %v1202_v61  ;;  %s1829_s6 = sld [smem:[#allocation3 + $0x54]] }
 0x25a   : > { %v1185_v3 = vpop.permute.xlu1 %1184  ;;  %v1199_v4 = vpop.permute.xlu0 %1198 }
 0x25b   : > { %v1189_v6 = vadd.f32 %v1185_v3, %v1175_v49  ;;  %v1247_v7 = vpop.permute.xlu2 %1246 }
 0x25d   : > { %v1203_v42 = vadd.f32 %v1199_v4, %v1189_v6 }
 0x25e   : > { %v1299_v36 = vstv %s1822_s5 }
 0x25f   : > { %v1211_v14 = vadd.f32 %v1209_v11, %v1203_v42  ;;  %v1300_v38 = vmul.f32 %v1299_v36, %v2723_v0  ;;  %v1301_v48 = vmul.f32 %v1299_v36, %v2739_v13  ;;  %v1391_v6 = vstv %s1829_s6 }
 0x260   : > { %1536 = vrot.lane.b32.xlu1 %v1532_v9, %s2086_s23  ;;  %1550 = vrot.lane.b32.xlu0 %v1546_v12, %s2087_s24  ;;  %v1392_v10 = vmul.f32 %v1391_v6, %v2774_v52 }
 0x261   : > { %1522 = vrot.lane.b32.xlu2 %v1518_v15, %s2085_s15  ;;  %v1225_v17 = vadd.f32 %v1221_v54, %v1211_v14  ;;  %s1836_s15 = sld [smem:[#allocation3 + $0x5b]] }
 0x262   : > { %v1219_v18 = vpop.permute.xlu1 %1218  ;;  %v1233_v19 = vpop.permute.xlu0 %1232 }
 0x263   : > { %v1224_v20 = vadd.f32 %v1219_v18, %v1210_v62  ;;  %v1263_v22 = vpop.permute.xlu2 %1262 }
 0x265   : > { %v1238_v46 = vadd.f32 %v1233_v19, %v1224_v20 }
 0x267   : > { %v1252_v26 = vadd.f32 %v1247_v7, %v1238_v46 }
 0x268   : > { %1552 = vrot.lane.b32.xlu1 %v1547_v21, %s2087_s24  ;;  %1566 = vrot.lane.b32.xlu0 %v1561_v39, %s2088_s29  ;;  %s1851_s24 = sshll.u32 %s2068_s12, 4 }
 0x269   : > { %1538 = vrot.lane.b32.xlu2 %v1533_v25, %s2086_s23  ;;  %s1741_s23 = sshll.u32 %s2211_s17, 4  ;;  %s1624_s3 = scalar_lea.hbm %s2920_s2, %s1851_s24 }
 0x26a   : > { %v1235_v27 = vpop.permute.xlu1 %1234  ;;  %v1249_v28 = vpop.permute.xlu0 %1248  ;;  %s193_s12 = scalar_lea.vmem [#allocation8], %s1741_s23  ;;  %s1627_s18 = sshll.u32 %s1624_s3, 4  ;;  %s1628_s18 = int_to_ptr.hbm [resolvable:$true] %s1627_s18 }
 0x26b   : > { %v1239_v33 = vadd.f32 %v1235_v27, %v1225_v17  ;;  %v1289_v29 = vpop.permute.xlu2 %1288  ;;  %v1393_v17 = vmul.f32 %v1391_v6, %v2790_v1  ;;  %s1625_s4 = sshll.u32 %s193_s12, 4  ;;  %s2004_s26 = sshra.s32 %s1628_s18, 4  ;;  %s1626_s4 = int_to_ptr.vmem [resolvable:$true] %s1625_s4  ;;  %s2005_s26 = int_to_ptr.hbm [resolvable:$true] %s2004_s26 }
 0x26c   : > { %s2006_s27 = scalar_lea.hbm %s2005_s26, 16  ;;  %p2011_p11 = scmp.lt.s32.totalorder %s2005_s26, %s2920_s2 }
 0x26d   : > { %v1253_v30 = vadd.f32 %v1249_v28, %v1239_v33  ;;  %p2007_p3 = scmp.ne.s32.totalorder %s2005_s26, %s2006_s27  ;;  %p2012_p12 = scmp.lt.s32.totalorder %s2010_s16, %s2006_s27 }
 0x26f   : > { %v1267_v47 = vadd.f32 %v1263_v22, %v1253_v30  ;;  %p2008_p5 = pnand %p2007_p3, %p2158_p8  ;;  %p2013_p0 = por %p2012_p12, %p2011_p11 }
 0x271   : > { %1564 = vrot.lane.b32.xlu2 %v1560_v31, %s2088_s29  ;;  %v1483_v31 = vstv %s1836_s15  ;;  %p2009_p7 = pneg %p2008_p5 }
 0x272   : > { %v1261_v32 = vpop.permute.xlu1 %1260  ;;  %v1275_v16 = vpop.permute.xlu0 %1274 }
 0x273   : > { %v1266_v34 = vadd.f32 %v1261_v32, %v1252_v26  ;;  %v1313_v35 = vpop.permute.xlu2 %1312  ;;  %p2014_p1 = pnand %p2013_p0, %p2009_p7 }
 0x275   : > { %v1280_v37 = vadd.f32 %v1275_v16, %v1266_v34  ;;  %v1484_v34 = vmul.f32 %v1483_v31, %v2825_v40 }
 0x277   : > { %v1294_v44 = vadd.f32 %v1289_v29, %v1280_v37 }
 0x279   : > { %v1302_v41 = vadd.f32 %v1300_v38, %v1294_v44 }
 0x27a   : > { %v1277_v23 = vpop.permute.xlu1 %1276  ;;  %v1291_v43 = vpop.permute.xlu0 %1290 }
 0x27b   : > { %v1281_v60 = vadd.f32 %v1277_v23, %v1267_v47  ;;  %v1339_v45 = vpop.permute.xlu2 %1338 }
 0x27d   : > { %v1295_v49 = vadd.f32 %v1291_v43, %v1281_v60 }
 0x27f   : > { %v1303_v50 = vadd.f32 %v1301_v48, %v1295_v49 }
 0x281   : > { %v1317_v61 = vadd.f32 %v1313_v35, %v1303_v50 }
 0x282   : > { %v1311_v56 = vpop.permute.xlu1 %1310  ;;  %v1325_v51 = vpop.permute.xlu0 %1324 }
 0x283   : > { %v1355_v54 = vpop.permute.xlu2 %1354  ;;  %v1316_v53 = vadd.f32 %v1311_v56, %v1302_v41  ;;  %v1485_v41 = vmul.f32 %v1483_v31, %v2841_v2 }
 0x285   : > { %v1330_v59 = vadd.f32 %v1325_v51, %v1316_v53 }
 0x287   : > { %v1344_v63 = vadd.f32 %v1339_v45, %v1330_v59 }
 0x28a   : > { %v1327_v55 = vpop.permute.xlu1 %1326  ;;  %v1341_v57 = vpop.permute.xlu0 %1340 }
 0x28b   : > { %v1381_v58 = vpop.permute.xlu2 %1380  ;;  %v1331_v0 = vadd.f32 %v1327_v55, %v1317_v61 }
 0x28d   : > { %v1345_v13 = vadd.f32 %v1341_v57, %v1331_v0 }
 0x28f   : > { %v1359_v11 = vadd.f32 %v1355_v54, %v1345_v13 }
 0x292   : > { %v1353_v5 = vpop.permute.xlu1 %1352  ;;  %v1367_v62 = vpop.permute.xlu0 %1366 }
 0x293   : > { %v1358_v3 = vadd.f32 %v1353_v5, %v1344_v63  ;;  %v1405_v4 = vpop.permute.xlu2 %1404 }
 0x295   : > { %v1372_v7 = vadd.f32 %v1367_v62, %v1358_v3 }
 0x297   : > { %v1386_v8 = vadd.f32 %v1381_v58, %v1372_v7 }
 0x299   : > { %v1394_v42 = vadd.f32 %v1392_v10, %v1386_v8 }
 0x29a   : > { %v1369_v9 = vpop.permute.xlu1 %1368  ;;  %v1383_v12 = vpop.permute.xlu0 %1382 }
 0x29b   : > { %v1373_v14 = vadd.f32 %v1369_v9, %v1359_v11  ;;  %v1431_v15 = vpop.permute.xlu2 %1430 }
 0x29d   : > { %v1387_v18 = vadd.f32 %v1383_v12, %v1373_v14 }
 0x29f   : > { %v1395_v19 = vadd.f32 %v1393_v17, %v1387_v18 }
 0x2a1   : > { %v1409_v52 = vadd.f32 %v1405_v4, %v1395_v19 }
 0x2a2   : > { %v1403_v20 = vpop.permute.xlu1 %1402  ;;  %v1417_v22 = vpop.permute.xlu0 %1416 }
 0x2a3   : > { %v1447_v46 = vpop.permute.xlu2 %1446  ;;  %v1408_v24 = vadd.f32 %v1403_v20, %v1394_v42 }
 0x2a5   : > { %v1422_v25 = vadd.f32 %v1417_v22, %v1408_v24 }
 0x2a7   : > { %v1436_v28 = vadd.f32 %v1431_v15, %v1422_v25 }
 0x2aa   : > { %v1419_v21 = vpop.permute.xlu1 %1418  ;;  %v1433_v39 = vpop.permute.xlu0 %1432 }
 0x2ab   : > { %v1473_v26 = vpop.permute.xlu2 %1472  ;;  %v1423_v27 = vadd.f32 %v1419_v21, %v1409_v52 }
 0x2ad   : > { %v1437_v47 = vadd.f32 %v1433_v39, %v1423_v27 }
 0x2af   : > { %v1451_v35 = vadd.f32 %v1447_v46, %v1437_v47 }
 0x2b2   : > { %v1445_v33 = vpop.permute.xlu1 %1444  ;;  %v1459_v29 = vpop.permute.xlu0 %1458 }
 0x2b3   : > { %v1450_v30 = vadd.f32 %v1445_v33, %v1436_v28  ;;  %v1497_v16 = vpop.permute.xlu2 %1496 }
 0x2b5   : > { %v1464_v1 = vadd.f32 %v1459_v29, %v1450_v30 }
 0x2b7   : > { %v1478_v32 = vadd.f32 %v1473_v26, %v1464_v1 }
 0x2b9   : > { %v1486_v36 = vadd.f32 %v1484_v34, %v1478_v32 }
 0x2ba   : > { %v1461_v37 = vpop.permute.xlu1 %1460  ;;  %v1475_v44 = vpop.permute.xlu0 %1474 }
 0x2bb   : > { %v1465_v38 = vadd.f32 %v1461_v37, %v1451_v35  ;;  %v1523_v60 = vpop.permute.xlu2 %1522 }
 0x2bd   : > { %v1479_v23 = vadd.f32 %v1475_v44, %v1465_v38 }
 0x2bf   : > { %v1487_v43 = vadd.f32 %v1485_v41, %v1479_v23 }
 0x2c1   : > { %v1501_v53 = vadd.f32 %v1497_v16, %v1487_v43 }
 0x2c2   : > { %v1495_v45 = vpop.permute.xlu1 %1494  ;;  %v1509_v48 = vpop.permute.xlu0 %1508 }
 0x2c3   : > { %v1500_v49 = vadd.f32 %v1495_v45, %v1486_v36  ;;  %v1539_v51 = vpop.permute.xlu2 %1538 }
 0x2c5   : > { %v1514_v54 = vadd.f32 %v1509_v48, %v1500_v49 }
 0x2c7   : > { %v1528_v40 = vadd.f32 %v1523_v60, %v1514_v54 }
 0x2ca   : > { %v1511_v50 = vpop.permute.xlu1 %1510  ;;  %v1525_v56 = vpop.permute.xlu0 %1524 }
 0x2cb   : > { %v1515_v55 = vadd.f32 %v1511_v50, %v1501_v53  ;;  %v1565_v63 = vpop.permute.xlu2 %1564 }
 0x2cd   : > { %v1529_v61 = vadd.f32 %v1525_v56, %v1515_v55 }
 0x2cf   : > { %v1543_v62 = vadd.f32 %v1539_v51, %v1529_v61 }
 0x2d2   : > { %v1537_v57 = vpop.permute.xlu1 %1536  ;;  %v1551_v58 = vpop.permute.xlu0 %1550 }
 0x2d3   : > { %v1542_v59 = vadd.f32 %v1537_v57, %v1528_v40 }
 0x2d5   : > { %v1556_v0 = vadd.f32 %v1551_v58, %v1542_v59 }
 0x2d7   : > { %v1570_v2 = vadd.f32 %v1565_v63, %v1556_v0 }
 0x2d9   : > { %v1843_v5 = vmul.f32 -1.442695, %v1570_v2 }
 0x2da   : > { %v1553_v3 = vpop.permute.xlu1 %1552  ;;  %v1567_v6 = vpop.permute.xlu0 %1566 }
 0x2db   : > { %1937 = vpow2.f32 %v1843_v5  ;;  %v1557_v4 = vadd.f32 %v1553_v3, %v1543_v62 }
 0x2dd   : > { %v1571_v13 = vadd.f32 %v1567_v6, %v1557_v4 }
 0x2df   : > { %v1844_v7 = vmul.f32 -1.442695, %v1571_v13 }
 0x2e1   : > { %v1938_v8 = vpop.eup %1937  ;;  %1939 = vpow2.f32 %v1844_v7 }
 0x2e2   : > { %v1578_v10 = vadd.f32 1.0, %v1938_v8 }
 0x2e4   : > { %1941 = vrcp.f32 %v1578_v10  ;;  %v1591_v15 = vand.u32 2147483648, %v1578_v10  ;;  %v1589_v18 = vand.u32 2147483647, %v1578_v10  ;;  %vm1585_vm6 = vweird.f32 %v1578_v10 }
 0x2e6   : > { %v1592_v46 = vor.u32 1.1754944e-38, %v1591_v15  ;;  %vm1590_vm8 = vcmp.eq.f32.partialorder %v1589_v18, 8.507059e+37 }
 0x2e7   : > { %v1940_v11 = vpop.eup %1939 }
 0x2e8   : > { %v1579_v42 = vadd.f32 1.0, %v1940_v11 }
 0x2ea   : > { %v1942_v9 = vpop.eup %1941  ;;  %1943 = vrcp.f32 %v1579_v42  ;;  %v1606_v39 = vand.u32 2147483648, %v1579_v42  ;;  %v1604_v52 = vand.u32 2147483647, %v1579_v42  ;;  %vm1600_vm10 = vweird.f32 %v1579_v42 }
 0x2eb   : > { %v1581_v12 = vmul.f32 %v1942_v9, %v1578_v10  ;;  %vm1586_vm5 = vweird.f32 %v1942_v9 }
 0x2ec   : > { %vm1587_vm7 = vmor %vm1585_vm6, %vm1586_vm5  ;;  %v1607_v28 = vor.u32 1.1754944e-38, %v1606_v39  ;;  %vm1605_vm12 = vcmp.eq.f32.partialorder %v1604_v52, 8.507059e+37 }
 0x2ed   : > { %v1582_v14 = vsub.f32 1.0, %v1581_v12 }
 0x2ef   : > { %v1583_v17 = vmul.f32 %v1942_v9, %v1582_v14 }
 0x2f0   : > { %v1944_v19 = vpop.eup %1943 }
 0x2f1   : > { %v1596_v20 = vmul.f32 %v1944_v19, %v1579_v42  ;;  %v1584_v22 = vadd.f32 %v1942_v9, %v1583_v17  ;;  %vm1601_vm9 = vweird.f32 %v1944_v19 }
 0x2f2   : > { %vm1602_vm11 = vmor %vm1600_vm10, %vm1601_vm9 }
 0x2f3   : > { %v1597_v24 = vsub.f32 1.0, %v1596_v20  ;;  %v1588_v21 = vsel %vm1587_vm7, %v1942_v9, %v1584_v22 }
 0x2f4   : > { %v1593_v25 = vsel %vm1590_vm8, %v1592_v46, %v1588_v21 }
 0x2f5   : > { %v1598_v26 = vmul.f32 %v1944_v19, %v1597_v24  ;;  %1610 = vst.msk [vmem:[%s193_s12] sm:$0xff] %vm223_vm0, %v1593_v25 }
 0x2f7   : > { %v1599_v27 = vadd.f32 %v1944_v19, %v1598_v26 }
 0x2f9   : > { %v1603_v33 = vsel %vm1602_vm11, %v1944_v19, %v1599_v27 }
 0x2fa   : > { %v1608_v29 = vsel %vm1605_vm12, %v1607_v28, %v1603_v33 }
 0x2fb   : > { %1611 = vst.msk [vmem:[%s193_s12 + $0x8] sm:$0xff] %vm223_vm0, %v1608_v29 }
 0x2fc   : > { %2017 = shalt.err (!%p2014_p1)
}
 0x2fd   : > { %s2089_s17 = smov 128   ;;  %s2090_s6 = smov 8  }
 0x2fe   : > { %1858 = dma.vmem_to_hbm [thread:$0]  (%p2158_p8), %s1626_s4, 256, %s1628_s18, %s1613_s20, %s2089_s17, %s2089_s17, %s2090_s6  }
 0x2ff PF: > { %s1642_s15 = sand.u32 1, %s2056_s9   ;;  %p1869_p2 = pnand %p1734_p13, %p2162_p9 }
 0x300   : > { %s1643_s23 = scalar_lea.sflag [#allocation5], %s1642_s15 }
 0x301   : > { %p1870_p4 = pneg %p1869_p2 }
 0x303   : > { %2051 = dma.done.wait (%p1870_p4), %s1643_s23, 256  }
 0x304   : > { %2053 = vsyncadd (%p1870_p4), %s1643_s23, 4294967040  ;;  %s19_s14 = sadd.s32 1, %s2076_s14   ;;  %s2928_s9 = smov %s2060_s10 }
 0x305   : > { %p16_p6 = scmp.ge.s32.totalorder %s19_s14, 4   ;;  %s2929_s10 = smov %s2064_s11 }
 0x306   : > { %s2930_s11 = smov %s2200_s19  ;;  %s2931_s12 = smov %s2072_s13 }
 0x307   : > { %s2932_s13 = smov %s2934_s28  ;;  %18 = sbr.rel (!%p16_p6) target bundleno = 7 (0x7), region = 90 }
 0x30c   :  { %1649 = vsyncpa [#allocation4], 1 }
 0x30d   :  { %1651 = vsyncpa [#allocation4 + $0x1], 1 }
 0x30e   :  { %1652 = vsyncpa [#allocation5], 1 }
 0x30f   :  { %1654 = vsyncpa [#allocation5 + $0x1], 1 }
 0x310   :  { %1655 = vsyncpa [#allocation6], 1 }
 0x311   :  { %1657 = vsyncpa [#allocation6 + $0x1], 1 }

</bundles_post_ra>
